<compile_context>
chip_gen: v6e
topology: v6e:2x2x1
jax: 0.10.0
libtpu: 0.0.40
codegen_flags: <defaults>
</compile_context>

<pallas_src>
import functools

import jax
import jax.numpy as jnp
from jax.experimental import pallas as pl
from jax.experimental.pallas import tpu as pltpu

EPS = 1e-5
VMEM_BUDGET = 40 * 1024 * 1024   # used to choose fused-vs-staged path / batch block
VMEM_LIMIT = 48 * 1024 * 1024    # scoped-VMEM request (headroom under v7x 64 MiB)
# bf16 matmul inputs only pay off once W*Cin is large enough to be MXU-bound; keep
# f32 at small channel counts so the verification tolerance stays tight.
USE_BF16_MATMUL = False


# --------------------------------------------------------------------------- #
# Wrapper-side weight folding (tiny, runs in XLA once per call under jit).
# --------------------------------------------------------------------------- #
def fold_conv_weights(w, Wdim, dtype=jnp.float32):
    """w: (3,3,Cin,Cout) HWIO -> m_cat: (Wdim*Cin, 3*Wdim*Cout).

    For a lane-dense activation slab X of shape (rows, Wdim*Cin) (lane = w*Cin + ci)
    the three horizontal taps AND the horizontal reflect padding are folded into one
    matrix; column block dy in {0,1,2} holds the dy-th vertical tap, so one MXU
    weight push per conv stage produces a0/a1/a2 at 128-aligned lane offsets.
    """
    Cin, Cout = w.shape[2], w.shape[3]
    # padded horizontal pixel p in [0, Wdim+1] sources unpadded pixel src[p]
    src = jnp.concatenate(
        [jnp.array([1], jnp.int32), jnp.arange(Wdim, dtype=jnp.int32),
         jnp.array([Wdim - 2], jnp.int32)])
    sel = jax.nn.one_hot(src, Wdim, dtype=jnp.float32)          # (Wdim+2, Wdim)
    ms = []
    for dy in range(3):
        m = jnp.zeros((Wdim * Cin, Wdim * Cout), jnp.float32)
        for dx in range(3):
            # S[s, wout] = 1 iff padded pixel (wout+dx) sources unpadded pixel s
            S = sel[dx:dx + Wdim, :].T                          # (Wdim, Wdim)
            m = m + jnp.einsum("sw,io->siwo", S, w[dy, dx]).reshape(
                Wdim * Cin, Wdim * Cout)
        ms.append(m)
    return jnp.concatenate(ms, axis=1).astype(dtype)            # (W*Cin, 3*W*Cout)


# --------------------------------------------------------------------------- #
# In-kernel 3x3 reflect-padded conv on a lane-dense row slab.
# --------------------------------------------------------------------------- #
def _conv3x3_slab(xin, mcat, H):
    """xin: (R, W*Cin) with R = (#images)*H, rows of each image contiguous.
    mcat: (W*Cin, 3*W*Cout) folded weights.  Returns (R, W*Cout)."""
    R = xin.shape[0]
    WCout = mcat.shape[1] // 3
    a = jnp.dot(xin.astype(mcat.dtype), mcat,
                preferred_element_type=jnp.float32)              # (R, 3*W*Cout)
    a0 = a[:, :WCout]              # dy = 0 tap (needs input row h-1)
    a1 = a[:, WCout:2 * WCout]     # dy = 1 tap (row h)
    a2 = a[:, 2 * WCout:]          # dy = 2 tap (row h+1)

    # Vertical taps + vertical reflect padding: XLU sublane rolls + per-image
    # first/last-row fix-ups (reflect: row -1 -> row 1, row H -> row H-2).
    up = pltpu.roll(a0, shift=1, axis=0)          # row r <- a0[r-1]
    up_fix = pltpu.roll(a0, shift=R - 1, axis=0)  # row r <- a0[r+1]
    dn = pltpu.roll(a2, shift=R - 1, axis=0)      # row r <- a2[r+1]
    dn_fix = pltpu.roll(a2, shift=1, axis=0)      # row r <- a2[r-1]

    row = jax.lax.broadcasted_iota(jnp.int32, (R, WCout), 0) % H
    return (a1
            + jnp.where(row == 0, up_fix, up)
            + jnp.where(row == H - 1, dn_fix, dn))


# --------------------------------------------------------------------------- #
# Fully-fused path: the whole network in ONE grid-less pallas_call (everything
# resident in VMEM).  Used whenever the estimate fits the VMEM budget.
# --------------------------------------------------------------------------- #
def _fused_kernel(H, W, x_ref, m0_ref, m1_ref, m2_ref, m3_ref, r_ref, rt_ref,
                  g0_ref, b0_ref, g1_ref, b1_ref, g2_ref, b2_ref, g3_ref, b3_ref,
                  out_ref):
    NH = x_ref.shape[0]
    inv_cnt = 1.0 / float(NH * W)          # 1 / (N*H*W)
    r = r_ref[...]                         # (W*C, C) lane -> channel reduction
    rt = rt_ref[...]                       # (C, W*C) channel -> lane broadcast

    def bn(y, g_ref, b_ref):
        # Two-pass, mean-subtracted variance (avoids E[y^2]-E[y]^2 cancellation).
        ch_sum = jnp.dot(jnp.sum(y, axis=0, keepdims=True), r,
                         preferred_element_type=jnp.float32)     # (1, C)
        mean_l = jnp.dot(ch_sum * inv_cnt, rt,
                         preferred_element_type=jnp.float32)     # (1, W*C)
        d = y - mean_l
        ch_sq = jnp.dot(jnp.sum(d * d, axis=0, keepdims=True), r,
                        preferred_element_type=jnp.float32)      # (1, C)
        var_l = jnp.dot(ch_sq * inv_cnt, rt,
                        preferred_element_type=jnp.float32)      # (1, W*C)
        return d * (g_ref[...] * jax.lax.rsqrt(var_l + EPS)) + b_ref[...]

    x = x_ref[...]
    y0 = _conv3x3_slab(x, m0_ref[...], H)                        # in_layer conv
    x1 = jnp.maximum(bn(y0, g0_ref, b0_ref), 0.0)                # in_layer BN+ReLU
    y1 = _conv3x3_slab(x1, m1_ref[...], H)                       # block conv1
    a = jnp.maximum(bn(y1, g1_ref, b1_ref), 0.0)
    y2 = _conv3x3_slab(a, m2_ref[...], H)                        # block conv2
    x2 = jnp.maximum(bn(y2, g2_ref, b2_ref) + x1, 0.0)           # residual + ReLU
    y3 = _conv3x3_slab(x2, m3_ref[...], H)                       # out_layer conv
    out_ref[...] = jnp.maximum(bn(y3, g3_ref, b3_ref), 0.0)


def _fused_forward(x, ms, p, N, H, W, planes):
    NH = N * H
    WC = W * planes
    lane_ch = jnp.arange(WC) % planes
    r = jax.nn.one_hot(lane_ch, planes, dtype=jnp.float32)       # (WC, C)
    rt = jnp.transpose(r)                                        # (C, WC)

    def tiled(v):
        return jnp.tile(v, W).reshape(1, WC).astype(jnp.float32)

    inputs = [x, *ms, r, rt,
              tiled(p["g0"]), tiled(p["b0"]), tiled(p["g1"]), tiled(p["b1"]),
              tiled(p["g2"]), tiled(p["b2"]), tiled(p["g3"]), tiled(p["b3"])]
    vmem = pl.BlockSpec(memory_space=pltpu.MemorySpace.VMEM)
    return pl.pallas_call(
        functools.partial(_fused_kernel, H, W),
        out_shape=jax.ShapeDtypeStruct((NH, WC), jnp.float32),
        in_specs=[vmem] * len(inputs),
        out_specs=vmem,
        compiler_params=pltpu.CompilerParams(vmem_limit_bytes=VMEM_LIMIT),
    )(*inputs)


def _fused_vmem_estimate(N, H, W, cin, planes):
    rows = N * H
    wcin, wc = W * cin, W * planes
    wbytes = 2 if USE_BF16_MATMUL else 4
    weights = (wcin * 3 * wc + 3 * wc * 3 * wc) * wbytes
    acts = 4 * rows * (wcin + 12 * wc)     # x + ~a dozen live f32 (rows, WC) slabs
    return weights + acts


# --------------------------------------------------------------------------- #
# Staged fallback path: one batch-blocked pallas_call per conv stage.
#   * prev-layer BN + ReLU (+ residual) fused into the stage's input path
#   * per-block BN partial sums written as separate outputs  -> grid "parallel"
# --------------------------------------------------------------------------- #
def _conv_stage_kernel(has_in_bn, has_res, H, *refs):
    refs = list(refs)
    x_ref = refs.pop(0)                    # (B*H, W*Cin) raw prev-layer conv output
    if has_in_bn:
        insc_ref = refs.pop(0)             # (1, W*Cin) prev-layer BN scale (tiled)
        insh_ref = refs.pop(0)             # (1, W*Cin) prev-layer BN shift
    if has_res:
        r_ref = refs.pop(0)                # (B*H, W*Cres) raw residual-source conv out
        rsc_ref = refs.pop(0)              # (1, W*Cres)
        rsh_ref = refs.pop(0)
    m_ref, y_ref, sum_ref, sq_ref = refs   # m: (W*Cin, 3*W*Cout)

    xin = x_ref[...]
    if has_in_bn:
        xin = xin * insc_ref[...] + insh_ref[...]                # fused prev BN
    if has_res:
        # identity branch: relu(bn(residual-source)) recomputed in-kernel
        xin = xin + jnp.maximum(r_ref[...] * rsc_ref[...] + rsh_ref[...], 0.0)
    if has_in_bn or has_res:
        xin = jnp.maximum(xin, 0.0)                              # fused ReLU

    y = _conv3x3_slab(xin, m_ref[...], H)
    y_ref[...] = y                                               # lane-dense store

    # Per-block partial BN statistics (NOT accumulated across grid steps, so the
    # batch grid axis can be "parallel" -> v7x megacore uses both TensorCores).
    s = jnp.sum(y, axis=0, keepdims=True)
    q = jnp.sum(y * y, axis=0, keepdims=True)
    sum_ref[...] = s.reshape(1, 1, s.shape[-1])
    sq_ref[...] = q.reshape(1, 1, q.shape[-1])


def _conv_stage(x, m, H, B, *, in_scale=None, in_shift=None,
                res=None, res_scale=None, res_shift=None):
    NH, WCin = x.shape
    WCout = m.shape[1] // 3
    N = NH // H
    nblk = N // B
    BH = B * H
    has_in_bn = in_scale is not None
    has_res = res is not None

    args = [x]
    in_specs = [pl.BlockSpec((BH, WCin), lambda n: (n, 0))]
    if has_in_bn:
        args += [in_scale, in_shift]
        in_specs += [pl.BlockSpec((1, WCin), lambda n: (0, 0)),
                     pl.BlockSpec((1, WCin), lambda n: (0, 0))]
    if has_res:
        WCres = res.shape[1]
        args += [res, res_scale, res_shift]
        in_specs += [pl.BlockSpec((BH, WCres), lambda n: (n, 0)),
                     pl.BlockSpec((1, WCres), lambda n: (0, 0)),
                     pl.BlockSpec((1, WCres), lambda n: (0, 0))]
    args += [m]
    in_specs += [pl.BlockSpec((m.shape[0], m.shape[1]), lambda n: (0, 0))]

    kernel = functools.partial(_conv_stage_kernel, has_in_bn, has_res, H)
    y, sums, sqs = pl.pallas_call(
        kernel,
        out_shape=(jax.ShapeDtypeStruct((NH, WCout), jnp.float32),
                   jax.ShapeDtypeStruct((nblk, 1, WCout), jnp.float32),
                   jax.ShapeDtypeStruct((nblk, 1, WCout), jnp.float32)),
        grid=(nblk,),
        in_specs=in_specs,
        out_specs=(pl.BlockSpec((BH, WCout), lambda n: (n, 0)),
                   pl.BlockSpec((1, 1, WCout), lambda n: (n, 0, 0)),
                   pl.BlockSpec((1, 1, WCout), lambda n: (n, 0, 0))),
        compiler_params=pltpu.CompilerParams(
            dimension_semantics=("parallel",),   # per-block stats -> no races
            vmem_limit_bytes=VMEM_LIMIT),
    )(*args)
    return y, sums, sqs


def _bn_scale_shift(sums, sqs, gamma, beta, W, cnt):
    """Per-block (sum, sum-of-squares) partials -> lane-tiled BN scale/shift."""
    C = gamma.shape[0]
    ch_sum = jnp.sum(sums, axis=(0, 1)).reshape(W, C).sum(axis=0)
    ch_sq = jnp.sum(sqs, axis=(0, 1)).reshape(W, C).sum(axis=0)
    mean = ch_sum / cnt
    # TODO(synk): E[y^2]-E[y]^2 cancels catastrophically for very large N*H*W; switch
    # this staged path to per-block (count, mean, M2) Welford merges if that regime
    # matters (the fused path already uses a two-pass mean-subtracted variance).
    var = jnp.maximum(ch_sq / cnt - mean * mean, 0.0)            # biased variance
    scale = gamma / jnp.sqrt(var + EPS)
    shift = beta - mean * scale
    return (jnp.tile(scale, W).reshape(1, W * C).astype(jnp.float32),
            jnp.tile(shift, W).reshape(1, W * C).astype(jnp.float32))


def _staged_block_vmem(B, H, wcin, wcout):
    rows = B * H
    wbytes = 2 if USE_BF16_MATMUL else 4
    return (4 * rows * wcin * 4                 # x + residual blocks, double-buffered
            + 2 * rows * wcout * 4              # y output block, double-buffered
            + 2 * wcin * 3 * wcout * wbytes     # folded weights (double-buffered)
            + 10 * rows * wcout * 4)            # in-kernel temporaries (a + rolls)


def _pick_images_per_block(N, H, wcin, wcout):
    for B in range(N, 0, -1):
        if N % B:
            continue
        if (B * H) % 8 and B != N:
            continue                            # keep sublane-aligned blocks
        if _staged_block_vmem(B, H, wcin, wcout) <= VMEM_BUDGET:
            return B
    # TODO(synk): halo-tile over H (block (TH+2, W*C)) when even one image per block
    # exceeds the VMEM budget.
    return 1


def _staged_forward(x, ms, p, N, H, W, planes, images_per_block):
    m0, m1, m2, m3 = ms
    wcin = x.shape[1]
    wc = W * planes
    B = images_per_block if images_per_block is not None else \
        _pick_images_per_block(N, H, max(wcin, wc), wc)
    if N % B:
        raise ValueError("images_per_block must divide the batch size")
    cnt = float(N * H * W)

    y0, s0, q0 = _conv_stage(x, m0, H, B)
    sc0, sh0 = _bn_scale_shift(s0, q0, p["g0"], p["b0"], W, cnt)
    y1, s1, q1 = _conv_stage(y0, m1, H, B, in_scale=sc0, in_shift=sh0)
    sc1, sh1 = _bn_scale_shift(s1, q1, p["g1"], p["b1"], W, cnt)
    y2, s2, q2 = _conv_stage(y1, m2, H, B, in_scale=sc1, in_shift=sh1)
    sc2, sh2 = _bn_scale_shift(s2, q2, p["g2"], p["b2"], W, cnt)
    y3, s3, q3 = _conv_stage(y2, m3, H, B, in_scale=sc2, in_shift=sh2,
                             res=y0, res_scale=sc0, res_shift=sh0)
    sc3, sh3 = _bn_scale_shift(s3, q3, p["g3"], p["b3"], W, cnt)
    # Final BN + ReLU in plain jnp: a tiny elementwise op is not worth a pallas_call
    # launch; XLA fuses it with the reshape/transpose back to NCHW.
    return jnp.maximum(y3 * sc3 + sh3, 0.0)


# --------------------------------------------------------------------------- #
# Full forward pass.  Public layout: NCHW (PyTorch).  Internal: lane-dense
# (N*H, W*C) slabs.
# --------------------------------------------------------------------------- #
def easy_conv2d_forward(x_nchw, p, *, path="auto", images_per_block=None):
    N, Cin, H, W = x_nchw.shape
    planes = p["g0"].shape[0]
    outplanes = p["w3"].shape[-1]
    if outplanes != planes:
        # out_layer's BN is declared with `planes` features in the PyTorch module.
        raise ValueError("Easy_Conv2d requires outplanes == planes (as in PyTorch).")

    x = jnp.transpose(x_nchw, (0, 2, 3, 1)).reshape(N * H, W * Cin).astype(jnp.float32)

    mdt = jnp.bfloat16 if USE_BF16_MATMUL else jnp.float32
    ms = (fold_conv_weights(p["w0"], W, mdt), fold_conv_weights(p["w1"], W, mdt),
          fold_conv_weights(p["w2"], W, mdt), fold_conv_weights(p["w3"], W, mdt))

    if path == "auto":
        path = ("fused"
                if _fused_vmem_estimate(N, H, W, Cin, planes) <= VMEM_BUDGET
                else "staged")

    if path == "fused":
        out = _fused_forward(x, ms, p, N, H, W, planes)
    elif path == "staged":
        out = _staged_forward(x, ms, p, N, H, W, planes, images_per_block)
    else:
        raise ValueError(f"unknown path {path!r}")

    out = out.reshape(N, H, W, outplanes)
    return jnp.transpose(out, (0, 3, 1, 2))                      # back to NCHW


# --------------------------------------------------------------------------- #
# Pure-JAX reference (verification only)
# --------------------------------------------------------------------------- #
def _ref_conv(x, w):
    xp = jnp.pad(x, ((0, 0), (1, 1), (1, 1), (0, 0)), mode="reflect")
    return jax.lax.conv_general_dilated(
        xp, w, (1, 1), "VALID", dimension_numbers=("NHWC", "HWIO", "NHWC"))


def _ref_bn(y, g, b):
    mean = jnp.mean(y, axis=(0, 1, 2))
    var = jnp.var(y, axis=(0, 1, 2))
    return (y - mean) / jnp.sqrt(var + EPS) * g + b


def easy_conv2d_reference(x_nchw, p):
    x = jnp.transpose(x_nchw, (0, 2, 3, 1)).astype(jnp.float32)
    x1 = jax.nn.relu(_ref_bn(_ref_conv(x, p["w0"]), p["g0"], p["b0"]))
    a = jax.nn.relu(_ref_bn(_ref_conv(x1, p["w1"]), p["g1"], p["b1"]))
    x2 = jax.nn.relu(_ref_bn(_ref_conv(a, p["w2"]), p["g2"], p["b2"]) + x1)
    out = jax.nn.relu(_ref_bn(_ref_conv(x2, p["w3"]), p["g3"], p["b3"]))
    return jnp.transpose(out, (0, 3, 1, 2))


# --------------------------------------------------------------------------- #
def init_params(key, inplanes, planes, outplanes):
    ks = jax.random.split(key, 8)

    def w(k, ci, co):
        return (0.1 * jax.random.normal(k, (3, 3, ci, co))).astype(jnp.float32)

    def gb(k, c):
        k1, k2 = jax.random.split(k)
        return ((1.0 + 0.1 * jax.random.normal(k1, (c,))).astype(jnp.float32),
                (0.05 * jax.random.normal(k2, (c,))).astype(jnp.float32))

    g0, b0 = gb(ks[4], planes)
    g1, b1 = gb(ks[5], planes)
    g2, b2 = gb(ks[6], planes)
    g3, b3 = gb(ks[7], planes)   # out_layer BN has `planes` params, as in PyTorch
    return dict(
        w0=w(ks[0], inplanes, planes), g0=g0, b0=b0,
        w1=w(ks[1], planes, planes), g1=g1, b1=b1,
        w2=w(ks[2], planes, planes), g2=g2, b2=b2,
        w3=w(ks[3], planes, outplanes), g3=g3, b3=b3,
    )


if __name__ == "__main__":
    inplanes, planes, outplanes = 4, 8, 8   # outplanes == planes (module's BN requires it)
    N, H, W = 2, 16, 16                     # W * planes = 128 -> fully lane-dense

    root = jax.random.PRNGKey(0)
    kx, kp = jax.random.split(root)
    x = jax.random.normal(kx, (N, inplanes, H, W), dtype=jnp.float32)  # NCHW input
    params = init_params(kp, inplanes, planes, outplanes)

    fwd = jax.jit(easy_conv2d_forward, static_argnames=("path", "images_per_block"))

    # Default ("auto") path at this size: the whole net in ONE fused pallas_call.
    out = jax.block_until_ready(fwd(x, params))
    # Staged fallback (4 batch-blocked pallas_calls), forced to a 2-step grid here.
    out_staged = jax.block_until_ready(fwd(x, params, path="staged",
                                           images_per_block=1))

    ref = jax.block_until_ready(easy_conv2d_reference(x, params))
    assert out.shape == (N, outplanes, H, W), out.shape
    err_fused = float(jnp.max(jnp.abs(out - ref)))
    err_staged = float(jnp.max(jnp.abs(out_staged - ref)))
    assert jnp.allclose(out, ref, atol=1e-3, rtol=1e-3), err_fused
    assert jnp.allclose(out_staged, ref, atol=1e-3, rtol=1e-3), err_staged

    print("KERNEL_OK")
</pallas_src>

<mosaic_0001>
module attributes {stable_mosaic.version = 11 : i64} {
  func.func @_fused_kernel(%arg0: memref<32x64xf32, #tpu.memory_space<vmem>>, %arg1: memref<64x384xf32, #tpu.memory_space<vmem>>, %arg2: memref<128x384xf32, #tpu.memory_space<vmem>>, %arg3: memref<128x384xf32, #tpu.memory_space<vmem>>, %arg4: memref<128x384xf32, #tpu.memory_space<vmem>>, %arg5: memref<128x8xf32, #tpu.memory_space<vmem>>, %arg6: memref<8x128xf32, #tpu.memory_space<vmem>>, %arg7: memref<1x128xf32, #tpu.memory_space<vmem>>, %arg8: memref<1x128xf32, #tpu.memory_space<vmem>>, %arg9: memref<1x128xf32, #tpu.memory_space<vmem>>, %arg10: memref<1x128xf32, #tpu.memory_space<vmem>>, %arg11: memref<1x128xf32, #tpu.memory_space<vmem>>, %arg12: memref<1x128xf32, #tpu.memory_space<vmem>>, %arg13: memref<1x128xf32, #tpu.memory_space<vmem>>, %arg14: memref<1x128xf32, #tpu.memory_space<vmem>>, %arg15: memref<32x128xf32, #tpu.memory_space<vmem>>) attributes {dimension_semantics = [], scalar_prefetch = 0 : i64, scratch_operands = 0 : i64, tpu.core_type = #tpu.core_type<tc>} {
    %c0 = arith.constant 0 : index
    %c0_0 = arith.constant 0 : index
    %0 = vector.load %arg5[%c0, %c0_0] : memref<128x8xf32, #tpu.memory_space<vmem>>, vector<128x8xf32>
    %c0_1 = arith.constant 0 : index
    %c0_2 = arith.constant 0 : index
    %1 = vector.load %arg6[%c0_1, %c0_2] : memref<8x128xf32, #tpu.memory_space<vmem>>, vector<8x128xf32>
    %c0_3 = arith.constant 0 : index
    %c0_4 = arith.constant 0 : index
    %2 = vector.load %arg0[%c0_3, %c0_4] : memref<32x64xf32, #tpu.memory_space<vmem>>, vector<32x64xf32>
    %c0_5 = arith.constant 0 : index
    %c0_6 = arith.constant 0 : index
    %3 = vector.load %arg1[%c0_5, %c0_6] : memref<64x384xf32, #tpu.memory_space<vmem>>, vector<64x384xf32>
    %cst = arith.constant dense<0.000000e+00> : vector<32x384xf32>
    %4 = tpu.matmul %2, %3, %cst {dimension_numbers = #tpu.dot_dimension_numbers<[1], [0], [0], [1], [0, 0, 1, 1], [], []>} : vector<32x64xf32>, vector<64x384xf32>, vector<32x384xf32> -> vector<32x384xf32>
    %5 = vector.extract_strided_slice %4 {offsets = [0, 0], sizes = [32, 128], strides = [1, 1]} : vector<32x384xf32> to vector<32x128xf32>
    %6 = vector.extract_strided_slice %4 {offsets = [0, 128], sizes = [32, 128], strides = [1, 1]} : vector<32x384xf32> to vector<32x128xf32>
    %7 = vector.extract_strided_slice %4 {offsets = [0, 256], sizes = [32, 128], strides = [1, 1]} : vector<32x384xf32> to vector<32x128xf32>
    %c1_i32 = arith.constant 1 : i32
    %8 = tpu.dynamic_rotate %5 by %c1_i32 dim 0 : vector<32x128xf32>, i32 -> vector<32x128xf32>
    %c31_i32 = arith.constant 31 : i32
    %9 = tpu.dynamic_rotate %5 by %c31_i32 dim 0 : vector<32x128xf32>, i32 -> vector<32x128xf32>
    %c31_i32_7 = arith.constant 31 : i32
    %10 = tpu.dynamic_rotate %7 by %c31_i32_7 dim 0 : vector<32x128xf32>, i32 -> vector<32x128xf32>
    %c1_i32_8 = arith.constant 1 : i32
    %11 = tpu.dynamic_rotate %7 by %c1_i32_8 dim 0 : vector<32x128xf32>, i32 -> vector<32x128xf32>
    %12 = tpu.iota {dimensions = array<i32: 0>} : vector<32x128xi32>
    %c16_i32 = arith.constant 16 : i32
    %c0_i32 = arith.constant 0 : i32
    %13 = arith.cmpi eq, %c16_i32, %c0_i32 : i32
    %c1_i32_9 = arith.constant 1 : i32
    %14 = arith.select %13, %c1_i32_9, %c16_i32 : i32
    %15 = vector.broadcast %14 : i32 to vector<32x128xi32>
    %16 = arith.remsi %12, %15 : vector<32x128xi32>
    %c0_i32_10 = arith.constant 0 : i32
    %17 = vector.broadcast %c0_i32_10 : i32 to vector<32x128xi32>
    %18 = arith.cmpi ne, %16, %17 : vector<32x128xi32>
    %c0_i32_11 = arith.constant 0 : i32
    %19 = vector.broadcast %c0_i32_11 : i32 to vector<32x128xi32>
    %20 = arith.cmpi slt, %16, %19 : vector<32x128xi32>
    %c0_i32_12 = arith.constant 0 : i32
    %21 = arith.cmpi slt, %14, %c0_i32_12 : i32
    %22 = vector.broadcast %21 : i1 to vector<32x128xi1>
    %23 = vector.broadcast %22 : vector<32x128xi1> to vector<32x128xi1>
    %24 = arith.xori %20, %23 : vector<32x128xi1>
    %25 = arith.andi %24, %18 : vector<32x128xi1>
    %26 = vector.broadcast %14 : i32 to vector<32x128xi32>
    %27 = arith.addi %16, %26 : vector<32x128xi32>
    %28 = arith.select %25, %27, %16 : vector<32x128xi1>, vector<32x128xi32>
    %c0_i32_13 = arith.constant 0 : i32
    %29 = vector.broadcast %c0_i32_13 : i32 to vector<32x128xi32>
    %30 = arith.cmpi eq, %28, %29 : vector<32x128xi32>
    %31 = arith.select %30, %9, %8 : vector<32x128xi1>, vector<32x128xf32>
    %32 = arith.addf %6, %31 : vector<32x128xf32>
    %c15_i32 = arith.constant 15 : i32
    %33 = vector.broadcast %c15_i32 : i32 to vector<32x128xi32>
    %34 = arith.cmpi eq, %28, %33 : vector<32x128xi32>
    %35 = arith.select %34, %11, %10 : vector<32x128xi1>, vector<32x128xf32>
    %36 = arith.addf %32, %35 : vector<32x128xf32>
    %cst_14 = arith.constant dense<0.000000e+00> : vector<128xf32>
    %37 = vector.multi_reduction <add>, %36, %cst_14 [0] : vector<32x128xf32> to vector<128xf32>
    %38 = vector.shape_cast %37 : vector<128xf32> to vector<1x128xf32>
    %cst_15 = arith.constant dense<0.000000e+00> : vector<1x8xf32>
    %39 = tpu.matmul %38, %0, %cst_15 {dimension_numbers = #tpu.dot_dimension_numbers<[1], [0], [0], [1], [0, 0, 1, 1], [], []>} : vector<1x128xf32>, vector<128x8xf32>, vector<1x8xf32> -> vector<1x8xf32>
    %cst_16 = arith.constant 0.001953125 : f32
    %40 = vector.broadcast %cst_16 : f32 to vector<1x8xf32>
    %41 = arith.mulf %39, %40 : vector<1x8xf32>
    %cst_17 = arith.constant dense<0.000000e+00> : vector<1x128xf32>
    %42 = tpu.matmul %41, %1, %cst_17 {dimension_numbers = #tpu.dot_dimension_numbers<[1], [0], [0], [1], [0, 0, 1, 1], [], []>} : vector<1x8xf32>, vector<8x128xf32>, vector<1x128xf32> -> vector<1x128xf32>
    %43 = vector.broadcast %42 : vector<1x128xf32> to vector<32x128xf32>
    %44 = arith.subf %36, %43 : vector<32x128xf32>
    %45 = arith.mulf %44, %44 : vector<32x128xf32>
    %cst_18 = arith.constant dense<0.000000e+00> : vector<128xf32>
    %46 = vector.multi_reduction <add>, %45, %cst_18 [0] : vector<32x128xf32> to vector<128xf32>
    %47 = vector.shape_cast %46 : vector<128xf32> to vector<1x128xf32>
    %cst_19 = arith.constant dense<0.000000e+00> : vector<1x8xf32>
    %48 = tpu.matmul %47, %0, %cst_19 {dimension_numbers = #tpu.dot_dimension_numbers<[1], [0], [0], [1], [0, 0, 1, 1], [], []>} : vector<1x128xf32>, vector<128x8xf32>, vector<1x8xf32> -> vector<1x8xf32>
    %cst_20 = arith.constant 0.001953125 : f32
    %49 = vector.broadcast %cst_20 : f32 to vector<1x8xf32>
    %50 = arith.mulf %48, %49 : vector<1x8xf32>
    %cst_21 = arith.constant dense<0.000000e+00> : vector<1x128xf32>
    %51 = tpu.matmul %50, %1, %cst_21 {dimension_numbers = #tpu.dot_dimension_numbers<[1], [0], [0], [1], [0, 0, 1, 1], [], []>} : vector<1x8xf32>, vector<8x128xf32>, vector<1x128xf32> -> vector<1x128xf32>
    %c0_22 = arith.constant 0 : index
    %c0_23 = arith.constant 0 : index
    %52 = vector.load %arg7[%c0_22, %c0_23] : memref<1x128xf32, #tpu.memory_space<vmem>>, vector<1x128xf32>
    %cst_24 = arith.constant 9.99999974E-6 : f32
    %53 = vector.broadcast %cst_24 : f32 to vector<1x128xf32>
    %54 = arith.addf %51, %53 : vector<1x128xf32>
    %55 = math.rsqrt %54 : vector<1x128xf32>
    %56 = arith.mulf %52, %55 : vector<1x128xf32>
    %57 = vector.broadcast %56 : vector<1x128xf32> to vector<32x128xf32>
    %58 = arith.mulf %44, %57 : vector<32x128xf32>
    %c0_25 = arith.constant 0 : index
    %c0_26 = arith.constant 0 : index
    %59 = vector.load %arg8[%c0_25, %c0_26] : memref<1x128xf32, #tpu.memory_space<vmem>>, vector<1x128xf32>
    %60 = vector.broadcast %59 : vector<1x128xf32> to vector<32x128xf32>
    %61 = arith.addf %58, %60 : vector<32x128xf32>
    %cst_27 = arith.constant 0.000000e+00 : f32
    %62 = vector.broadcast %cst_27 : f32 to vector<32x128xf32>
    %63 = arith.maximumf %61, %62 : vector<32x128xf32>
    %c0_28 = arith.constant 0 : index
    %c0_29 = arith.constant 0 : index
    %64 = vector.load %arg2[%c0_28, %c0_29] : memref<128x384xf32, #tpu.memory_space<vmem>>, vector<128x384xf32>
    %cst_30 = arith.constant dense<0.000000e+00> : vector<32x384xf32>
    %65 = tpu.matmul %63, %64, %cst_30 {dimension_numbers = #tpu.dot_dimension_numbers<[1], [0], [0], [1], [0, 0, 1, 1], [], []>} : vector<32x128xf32>, vector<128x384xf32>, vector<32x384xf32> -> vector<32x384xf32>
    %66 = vector.extract_strided_slice %65 {offsets = [0, 0], sizes = [32, 128], strides = [1, 1]} : vector<32x384xf32> to vector<32x128xf32>
    %67 = vector.extract_strided_slice %65 {offsets = [0, 128], sizes = [32, 128], strides = [1, 1]} : vector<32x384xf32> to vector<32x128xf32>
    %68 = vector.extract_strided_slice %65 {offsets = [0, 256], sizes = [32, 128], strides = [1, 1]} : vector<32x384xf32> to vector<32x128xf32>
    %c1_i32_31 = arith.constant 1 : i32
    %69 = tpu.dynamic_rotate %66 by %c1_i32_31 dim 0 : vector<32x128xf32>, i32 -> vector<32x128xf32>
    %c31_i32_32 = arith.constant 31 : i32
    %70 = tpu.dynamic_rotate %66 by %c31_i32_32 dim 0 : vector<32x128xf32>, i32 -> vector<32x128xf32>
    %c31_i32_33 = arith.constant 31 : i32
    %71 = tpu.dynamic_rotate %68 by %c31_i32_33 dim 0 : vector<32x128xf32>, i32 -> vector<32x128xf32>
    %c1_i32_34 = arith.constant 1 : i32
    %72 = tpu.dynamic_rotate %68 by %c1_i32_34 dim 0 : vector<32x128xf32>, i32 -> vector<32x128xf32>
    %73 = tpu.iota {dimensions = array<i32: 0>} : vector<32x128xi32>
    %c16_i32_35 = arith.constant 16 : i32
    %c0_i32_36 = arith.constant 0 : i32
    %74 = arith.cmpi eq, %c16_i32_35, %c0_i32_36 : i32
    %c1_i32_37 = arith.constant 1 : i32
    %75 = arith.select %74, %c1_i32_37, %c16_i32_35 : i32
    %76 = vector.broadcast %75 : i32 to vector<32x128xi32>
    %77 = arith.remsi %73, %76 : vector<32x128xi32>
    %c0_i32_38 = arith.constant 0 : i32
    %78 = vector.broadcast %c0_i32_38 : i32 to vector<32x128xi32>
    %79 = arith.cmpi ne, %77, %78 : vector<32x128xi32>
    %c0_i32_39 = arith.constant 0 : i32
    %80 = vector.broadcast %c0_i32_39 : i32 to vector<32x128xi32>
    %81 = arith.cmpi slt, %77, %80 : vector<32x128xi32>
    %c0_i32_40 = arith.constant 0 : i32
    %82 = arith.cmpi slt, %75, %c0_i32_40 : i32
    %83 = vector.broadcast %82 : i1 to vector<32x128xi1>
    %84 = vector.broadcast %83 : vector<32x128xi1> to vector<32x128xi1>
    %85 = arith.xori %81, %84 : vector<32x128xi1>
    %86 = arith.andi %85, %79 : vector<32x128xi1>
    %87 = vector.broadcast %75 : i32 to vector<32x128xi32>
    %88 = arith.addi %77, %87 : vector<32x128xi32>
    %89 = arith.select %86, %88, %77 : vector<32x128xi1>, vector<32x128xi32>
    %c0_i32_41 = arith.constant 0 : i32
    %90 = vector.broadcast %c0_i32_41 : i32 to vector<32x128xi32>
    %91 = arith.cmpi eq, %89, %90 : vector<32x128xi32>
    %92 = arith.select %91, %70, %69 : vector<32x128xi1>, vector<32x128xf32>
    %93 = arith.addf %67, %92 : vector<32x128xf32>
    %c15_i32_42 = arith.constant 15 : i32
    %94 = vector.broadcast %c15_i32_42 : i32 to vector<32x128xi32>
    %95 = arith.cmpi eq, %89, %94 : vector<32x128xi32>
    %96 = arith.select %95, %72, %71 : vector<32x128xi1>, vector<32x128xf32>
    %97 = arith.addf %93, %96 : vector<32x128xf32>
    %cst_43 = arith.constant dense<0.000000e+00> : vector<128xf32>
    %98 = vector.multi_reduction <add>, %97, %cst_43 [0] : vector<32x128xf32> to vector<128xf32>
    %99 = vector.shape_cast %98 : vector<128xf32> to vector<1x128xf32>
    %cst_44 = arith.constant dense<0.000000e+00> : vector<1x8xf32>
    %100 = tpu.matmul %99, %0, %cst_44 {dimension_numbers = #tpu.dot_dimension_numbers<[1], [0], [0], [1], [0, 0, 1, 1], [], []>} : vector<1x128xf32>, vector<128x8xf32>, vector<1x8xf32> -> vector<1x8xf32>
    %cst_45 = arith.constant 0.001953125 : f32
    %101 = vector.broadcast %cst_45 : f32 to vector<1x8xf32>
    %102 = arith.mulf %100, %101 : vector<1x8xf32>
    %cst_46 = arith.constant dense<0.000000e+00> : vector<1x128xf32>
    %103 = tpu.matmul %102, %1, %cst_46 {dimension_numbers = #tpu.dot_dimension_numbers<[1], [0], [0], [1], [0, 0, 1, 1], [], []>} : vector<1x8xf32>, vector<8x128xf32>, vector<1x128xf32> -> vector<1x128xf32>
    %104 = vector.broadcast %103 : vector<1x128xf32> to vector<32x128xf32>
    %105 = arith.subf %97, %104 : vector<32x128xf32>
    %106 = arith.mulf %105, %105 : vector<32x128xf32>
    %cst_47 = arith.constant dense<0.000000e+00> : vector<128xf32>
    %107 = vector.multi_reduction <add>, %106, %cst_47 [0] : vector<32x128xf32> to vector<128xf32>
    %108 = vector.shape_cast %107 : vector<128xf32> to vector<1x128xf32>
    %cst_48 = arith.constant dense<0.000000e+00> : vector<1x8xf32>
    %109 = tpu.matmul %108, %0, %cst_48 {dimension_numbers = #tpu.dot_dimension_numbers<[1], [0], [0], [1], [0, 0, 1, 1], [], []>} : vector<1x128xf32>, vector<128x8xf32>, vector<1x8xf32> -> vector<1x8xf32>
    %cst_49 = arith.constant 0.001953125 : f32
    %110 = vector.broadcast %cst_49 : f32 to vector<1x8xf32>
    %111 = arith.mulf %109, %110 : vector<1x8xf32>
    %cst_50 = arith.constant dense<0.000000e+00> : vector<1x128xf32>
    %112 = tpu.matmul %111, %1, %cst_50 {dimension_numbers = #tpu.dot_dimension_numbers<[1], [0], [0], [1], [0, 0, 1, 1], [], []>} : vector<1x8xf32>, vector<8x128xf32>, vector<1x128xf32> -> vector<1x128xf32>
    %c0_51 = arith.constant 0 : index
    %c0_52 = arith.constant 0 : index
    %113 = vector.load %arg9[%c0_51, %c0_52] : memref<1x128xf32, #tpu.memory_space<vmem>>, vector<1x128xf32>
    %cst_53 = arith.constant 9.99999974E-6 : f32
    %114 = vector.broadcast %cst_53 : f32 to vector<1x128xf32>
    %115 = arith.addf %112, %114 : vector<1x128xf32>
    %116 = math.rsqrt %115 : vector<1x128xf32>
    %117 = arith.mulf %113, %116 : vector<1x128xf32>
    %118 = vector.broadcast %117 : vector<1x128xf32> to vector<32x128xf32>
    %119 = arith.mulf %105, %118 : vector<32x128xf32>
    %c0_54 = arith.constant 0 : index
    %c0_55 = arith.constant 0 : index
    %120 = vector.load %arg10[%c0_54, %c0_55] : memref<1x128xf32, #tpu.memory_space<vmem>>, vector<1x128xf32>
    %121 = vector.broadcast %120 : vector<1x128xf32> to vector<32x128xf32>
    %122 = arith.addf %119, %121 : vector<32x128xf32>
    %cst_56 = arith.constant 0.000000e+00 : f32
    %123 = vector.broadcast %cst_56 : f32 to vector<32x128xf32>
    %124 = arith.maximumf %122, %123 : vector<32x128xf32>
    %c0_57 = arith.constant 0 : index
    %c0_58 = arith.constant 0 : index
    %125 = vector.load %arg3[%c0_57, %c0_58] : memref<128x384xf32, #tpu.memory_space<vmem>>, vector<128x384xf32>
    %cst_59 = arith.constant dense<0.000000e+00> : vector<32x384xf32>
    %126 = tpu.matmul %124, %125, %cst_59 {dimension_numbers = #tpu.dot_dimension_numbers<[1], [0], [0], [1], [0, 0, 1, 1], [], []>} : vector<32x128xf32>, vector<128x384xf32>, vector<32x384xf32> -> vector<32x384xf32>
    %127 = vector.extract_strided_slice %126 {offsets = [0, 0], sizes = [32, 128], strides = [1, 1]} : vector<32x384xf32> to vector<32x128xf32>
    %128 = vector.extract_strided_slice %126 {offsets = [0, 128], sizes = [32, 128], strides = [1, 1]} : vector<32x384xf32> to vector<32x128xf32>
    %129 = vector.extract_strided_slice %126 {offsets = [0, 256], sizes = [32, 128], strides = [1, 1]} : vector<32x384xf32> to vector<32x128xf32>
    %c1_i32_60 = arith.constant 1 : i32
    %130 = tpu.dynamic_rotate %127 by %c1_i32_60 dim 0 : vector<32x128xf32>, i32 -> vector<32x128xf32>
    %c31_i32_61 = arith.constant 31 : i32
    %131 = tpu.dynamic_rotate %127 by %c31_i32_61 dim 0 : vector<32x128xf32>, i32 -> vector<32x128xf32>
    %c31_i32_62 = arith.constant 31 : i32
    %132 = tpu.dynamic_rotate %129 by %c31_i32_62 dim 0 : vector<32x128xf32>, i32 -> vector<32x128xf32>
    %c1_i32_63 = arith.constant 1 : i32
    %133 = tpu.dynamic_rotate %129 by %c1_i32_63 dim 0 : vector<32x128xf32>, i32 -> vector<32x128xf32>
    %134 = tpu.iota {dimensions = array<i32: 0>} : vector<32x128xi32>
    %c16_i32_64 = arith.constant 16 : i32
    %c0_i32_65 = arith.constant 0 : i32
    %135 = arith.cmpi eq, %c16_i32_64, %c0_i32_65 : i32
    %c1_i32_66 = arith.constant 1 : i32
    %136 = arith.select %135, %c1_i32_66, %c16_i32_64 : i32
    %137 = vector.broadcast %136 : i32 to vector<32x128xi32>
    %138 = arith.remsi %134, %137 : vector<32x128xi32>
    %c0_i32_67 = arith.constant 0 : i32
    %139 = vector.broadcast %c0_i32_67 : i32 to vector<32x128xi32>
    %140 = arith.cmpi ne, %138, %139 : vector<32x128xi32>
    %c0_i32_68 = arith.constant 0 : i32
    %141 = vector.broadcast %c0_i32_68 : i32 to vector<32x128xi32>
    %142 = arith.cmpi slt, %138, %141 : vector<32x128xi32>
    %c0_i32_69 = arith.constant 0 : i32
    %143 = arith.cmpi slt, %136, %c0_i32_69 : i32
    %144 = vector.broadcast %143 : i1 to vector<32x128xi1>
    %145 = vector.broadcast %144 : vector<32x128xi1> to vector<32x128xi1>
    %146 = arith.xori %142, %145 : vector<32x128xi1>
    %147 = arith.andi %146, %140 : vector<32x128xi1>
    %148 = vector.broadcast %136 : i32 to vector<32x128xi32>
    %149 = arith.addi %138, %148 : vector<32x128xi32>
    %150 = arith.select %147, %149, %138 : vector<32x128xi1>, vector<32x128xi32>
    %c0_i32_70 = arith.constant 0 : i32
    %151 = vector.broadcast %c0_i32_70 : i32 to vector<32x128xi32>
    %152 = arith.cmpi eq, %150, %151 : vector<32x128xi32>
    %153 = arith.select %152, %131, %130 : vector<32x128xi1>, vector<32x128xf32>
    %154 = arith.addf %128, %153 : vector<32x128xf32>
    %c15_i32_71 = arith.constant 15 : i32
    %155 = vector.broadcast %c15_i32_71 : i32 to vector<32x128xi32>
    %156 = arith.cmpi eq, %150, %155 : vector<32x128xi32>
    %157 = arith.select %156, %133, %132 : vector<32x128xi1>, vector<32x128xf32>
    %158 = arith.addf %154, %157 : vector<32x128xf32>
    %cst_72 = arith.constant dense<0.000000e+00> : vector<128xf32>
    %159 = vector.multi_reduction <add>, %158, %cst_72 [0] : vector<32x128xf32> to vector<128xf32>
    %160 = vector.shape_cast %159 : vector<128xf32> to vector<1x128xf32>
    %cst_73 = arith.constant dense<0.000000e+00> : vector<1x8xf32>
    %161 = tpu.matmul %160, %0, %cst_73 {dimension_numbers = #tpu.dot_dimension_numbers<[1], [0], [0], [1], [0, 0, 1, 1], [], []>} : vector<1x128xf32>, vector<128x8xf32>, vector<1x8xf32> -> vector<1x8xf32>
    %cst_74 = arith.constant 0.001953125 : f32
    %162 = vector.broadcast %cst_74 : f32 to vector<1x8xf32>
    %163 = arith.mulf %161, %162 : vector<1x8xf32>
    %cst_75 = arith.constant dense<0.000000e+00> : vector<1x128xf32>
    %164 = tpu.matmul %163, %1, %cst_75 {dimension_numbers = #tpu.dot_dimension_numbers<[1], [0], [0], [1], [0, 0, 1, 1], [], []>} : vector<1x8xf32>, vector<8x128xf32>, vector<1x128xf32> -> vector<1x128xf32>
    %165 = vector.broadcast %164 : vector<1x128xf32> to vector<32x128xf32>
    %166 = arith.subf %158, %165 : vector<32x128xf32>
    %167 = arith.mulf %166, %166 : vector<32x128xf32>
    %cst_76 = arith.constant dense<0.000000e+00> : vector<128xf32>
    %168 = vector.multi_reduction <add>, %167, %cst_76 [0] : vector<32x128xf32> to vector<128xf32>
    %169 = vector.shape_cast %168 : vector<128xf32> to vector<1x128xf32>
    %cst_77 = arith.constant dense<0.000000e+00> : vector<1x8xf32>
    %170 = tpu.matmul %169, %0, %cst_77 {dimension_numbers = #tpu.dot_dimension_numbers<[1], [0], [0], [1], [0, 0, 1, 1], [], []>} : vector<1x128xf32>, vector<128x8xf32>, vector<1x8xf32> -> vector<1x8xf32>
    %cst_78 = arith.constant 0.001953125 : f32
    %171 = vector.broadcast %cst_78 : f32 to vector<1x8xf32>
    %172 = arith.mulf %170, %171 : vector<1x8xf32>
    %cst_79 = arith.constant dense<0.000000e+00> : vector<1x128xf32>
    %173 = tpu.matmul %172, %1, %cst_79 {dimension_numbers = #tpu.dot_dimension_numbers<[1], [0], [0], [1], [0, 0, 1, 1], [], []>} : vector<1x8xf32>, vector<8x128xf32>, vector<1x128xf32> -> vector<1x128xf32>
    %c0_80 = arith.constant 0 : index
    %c0_81 = arith.constant 0 : index
    %174 = vector.load %arg11[%c0_80, %c0_81] : memref<1x128xf32, #tpu.memory_space<vmem>>, vector<1x128xf32>
    %cst_82 = arith.constant 9.99999974E-6 : f32
    %175 = vector.broadcast %cst_82 : f32 to vector<1x128xf32>
    %176 = arith.addf %173, %175 : vector<1x128xf32>
    %177 = math.rsqrt %176 : vector<1x128xf32>
    %178 = arith.mulf %174, %177 : vector<1x128xf32>
    %179 = vector.broadcast %178 : vector<1x128xf32> to vector<32x128xf32>
    %180 = arith.mulf %166, %179 : vector<32x128xf32>
    %c0_83 = arith.constant 0 : index
    %c0_84 = arith.constant 0 : index
    %181 = vector.load %arg12[%c0_83, %c0_84] : memref<1x128xf32, #tpu.memory_space<vmem>>, vector<1x128xf32>
    %182 = vector.broadcast %181 : vector<1x128xf32> to vector<32x128xf32>
    %183 = arith.addf %180, %182 : vector<32x128xf32>
    %184 = arith.addf %183, %63 : vector<32x128xf32>
    %cst_85 = arith.constant 0.000000e+00 : f32
    %185 = vector.broadcast %cst_85 : f32 to vector<32x128xf32>
    %186 = arith.maximumf %184, %185 : vector<32x128xf32>
    %c0_86 = arith.constant 0 : index
    %c0_87 = arith.constant 0 : index
    %187 = vector.load %arg4[%c0_86, %c0_87] : memref<128x384xf32, #tpu.memory_space<vmem>>, vector<128x384xf32>
    %cst_88 = arith.constant dense<0.000000e+00> : vector<32x384xf32>
    %188 = tpu.matmul %186, %187, %cst_88 {dimension_numbers = #tpu.dot_dimension_numbers<[1], [0], [0], [1], [0, 0, 1, 1], [], []>} : vector<32x128xf32>, vector<128x384xf32>, vector<32x384xf32> -> vector<32x384xf32>
    %189 = vector.extract_strided_slice %188 {offsets = [0, 0], sizes = [32, 128], strides = [1, 1]} : vector<32x384xf32> to vector<32x128xf32>
    %190 = vector.extract_strided_slice %188 {offsets = [0, 128], sizes = [32, 128], strides = [1, 1]} : vector<32x384xf32> to vector<32x128xf32>
    %191 = vector.extract_strided_slice %188 {offsets = [0, 256], sizes = [32, 128], strides = [1, 1]} : vector<32x384xf32> to vector<32x128xf32>
    %c1_i32_89 = arith.constant 1 : i32
    %192 = tpu.dynamic_rotate %189 by %c1_i32_89 dim 0 : vector<32x128xf32>, i32 -> vector<32x128xf32>
    %c31_i32_90 = arith.constant 31 : i32
    %193 = tpu.dynamic_rotate %189 by %c31_i32_90 dim 0 : vector<32x128xf32>, i32 -> vector<32x128xf32>
    %c31_i32_91 = arith.constant 31 : i32
    %194 = tpu.dynamic_rotate %191 by %c31_i32_91 dim 0 : vector<32x128xf32>, i32 -> vector<32x128xf32>
    %c1_i32_92 = arith.constant 1 : i32
    %195 = tpu.dynamic_rotate %191 by %c1_i32_92 dim 0 : vector<32x128xf32>, i32 -> vector<32x128xf32>
    %196 = tpu.iota {dimensions = array<i32: 0>} : vector<32x128xi32>
    %c16_i32_93 = arith.constant 16 : i32
    %c0_i32_94 = arith.constant 0 : i32
    %197 = arith.cmpi eq, %c16_i32_93, %c0_i32_94 : i32
    %c1_i32_95 = arith.constant 1 : i32
    %198 = arith.select %197, %c1_i32_95, %c16_i32_93 : i32
    %199 = vector.broadcast %198 : i32 to vector<32x128xi32>
    %200 = arith.remsi %196, %199 : vector<32x128xi32>
    %c0_i32_96 = arith.constant 0 : i32
    %201 = vector.broadcast %c0_i32_96 : i32 to vector<32x128xi32>
    %202 = arith.cmpi ne, %200, %201 : vector<32x128xi32>
    %c0_i32_97 = arith.constant 0 : i32
    %203 = vector.broadcast %c0_i32_97 : i32 to vector<32x128xi32>
    %204 = arith.cmpi slt, %200, %203 : vector<32x128xi32>
    %c0_i32_98 = arith.constant 0 : i32
    %205 = arith.cmpi slt, %198, %c0_i32_98 : i32
    %206 = vector.broadcast %205 : i1 to vector<32x128xi1>
    %207 = vector.broadcast %206 : vector<32x128xi1> to vector<32x128xi1>
    %208 = arith.xori %204, %207 : vector<32x128xi1>
    %209 = arith.andi %208, %202 : vector<32x128xi1>
    %210 = vector.broadcast %198 : i32 to vector<32x128xi32>
    %211 = arith.addi %200, %210 : vector<32x128xi32>
    %212 = arith.select %209, %211, %200 : vector<32x128xi1>, vector<32x128xi32>
    %c0_i32_99 = arith.constant 0 : i32
    %213 = vector.broadcast %c0_i32_99 : i32 to vector<32x128xi32>
    %214 = arith.cmpi eq, %212, %213 : vector<32x128xi32>
    %215 = arith.select %214, %193, %192 : vector<32x128xi1>, vector<32x128xf32>
    %216 = arith.addf %190, %215 : vector<32x128xf32>
    %c15_i32_100 = arith.constant 15 : i32
    %217 = vector.broadcast %c15_i32_100 : i32 to vector<32x128xi32>
    %218 = arith.cmpi eq, %212, %217 : vector<32x128xi32>
    %219 = arith.select %218, %195, %194 : vector<32x128xi1>, vector<32x128xf32>
    %220 = arith.addf %216, %219 : vector<32x128xf32>
    %cst_101 = arith.constant dense<0.000000e+00> : vector<128xf32>
    %221 = vector.multi_reduction <add>, %220, %cst_101 [0] : vector<32x128xf32> to vector<128xf32>
    %222 = vector.shape_cast %221 : vector<128xf32> to vector<1x128xf32>
    %cst_102 = arith.constant dense<0.000000e+00> : vector<1x8xf32>
    %223 = tpu.matmul %222, %0, %cst_102 {dimension_numbers = #tpu.dot_dimension_numbers<[1], [0], [0], [1], [0, 0, 1, 1], [], []>} : vector<1x128xf32>, vector<128x8xf32>, vector<1x8xf32> -> vector<1x8xf32>
    %cst_103 = arith.constant 0.001953125 : f32
    %224 = vector.broadcast %cst_103 : f32 to vector<1x8xf32>
    %225 = arith.mulf %223, %224 : vector<1x8xf32>
    %cst_104 = arith.constant dense<0.000000e+00> : vector<1x128xf32>
    %226 = tpu.matmul %225, %1, %cst_104 {dimension_numbers = #tpu.dot_dimension_numbers<[1], [0], [0], [1], [0, 0, 1, 1], [], []>} : vector<1x8xf32>, vector<8x128xf32>, vector<1x128xf32> -> vector<1x128xf32>
    %227 = vector.broadcast %226 : vector<1x128xf32> to vector<32x128xf32>
    %228 = arith.subf %220, %227 : vector<32x128xf32>
    %229 = arith.mulf %228, %228 : vector<32x128xf32>
    %cst_105 = arith.constant dense<0.000000e+00> : vector<128xf32>
    %230 = vector.multi_reduction <add>, %229, %cst_105 [0] : vector<32x128xf32> to vector<128xf32>
    %231 = vector.shape_cast %230 : vector<128xf32> to vector<1x128xf32>
    %cst_106 = arith.constant dense<0.000000e+00> : vector<1x8xf32>
    %232 = tpu.matmul %231, %0, %cst_106 {dimension_numbers = #tpu.dot_dimension_numbers<[1], [0], [0], [1], [0, 0, 1, 1], [], []>} : vector<1x128xf32>, vector<128x8xf32>, vector<1x8xf32> -> vector<1x8xf32>
    %cst_107 = arith.constant 0.001953125 : f32
    %233 = vector.broadcast %cst_107 : f32 to vector<1x8xf32>
    %234 = arith.mulf %232, %233 : vector<1x8xf32>
    %cst_108 = arith.constant dense<0.000000e+00> : vector<1x128xf32>
    %235 = tpu.matmul %234, %1, %cst_108 {dimension_numbers = #tpu.dot_dimension_numbers<[1], [0], [0], [1], [0, 0, 1, 1], [], []>} : vector<1x8xf32>, vector<8x128xf32>, vector<1x128xf32> -> vector<1x128xf32>
    %c0_109 = arith.constant 0 : index
    %c0_110 = arith.constant 0 : index
    %236 = vector.load %arg13[%c0_109, %c0_110] : memref<1x128xf32, #tpu.memory_space<vmem>>, vector<1x128xf32>
    %cst_111 = arith.constant 9.99999974E-6 : f32
    %237 = vector.broadcast %cst_111 : f32 to vector<1x128xf32>
    %238 = arith.addf %235, %237 : vector<1x128xf32>
    %239 = math.rsqrt %238 : vector<1x128xf32>
    %240 = arith.mulf %236, %239 : vector<1x128xf32>
    %241 = vector.broadcast %240 : vector<1x128xf32> to vector<32x128xf32>
    %242 = arith.mulf %228, %241 : vector<32x128xf32>
    %c0_112 = arith.constant 0 : index
    %c0_113 = arith.constant 0 : index
    %243 = vector.load %arg14[%c0_112, %c0_113] : memref<1x128xf32, #tpu.memory_space<vmem>>, vector<1x128xf32>
    %244 = vector.broadcast %243 : vector<1x128xf32> to vector<32x128xf32>
    %245 = arith.addf %242, %244 : vector<32x128xf32>
    %cst_114 = arith.constant 0.000000e+00 : f32
    %246 = vector.broadcast %cst_114 : f32 to vector<32x128xf32>
    %247 = arith.maximumf %245, %246 : vector<32x128xf32>
    %c0_115 = arith.constant 0 : index
    %c0_116 = arith.constant 0 : index
    %248 = vector.load %arg15[%c0_115, %c0_116] : memref<32x128xf32, #tpu.memory_space<vmem>>, vector<32x128xf32>
    tpu.vector_store %arg15[%c0_115, %c0_116], %247 {strides = array<i32>} : memref<32x128xf32, #tpu.memory_space<vmem>>, vector<32x128xf32>,
    return
  }
}

</mosaic_0001>

<bundles_post_ra>
// kernel: tile.48
= control target key start
LH: loop header
LB: loop body
LE: loop exit
PB: predicated region body
PF: predicated region fallthrough
CT: control target
= control target key end

     0   :  { %s28_s0 = inlined_call_operand.vmem [shape: f32[8], index: 0, kind: input, shape index: {}]   ;;  %s29_s1 = inlined_call_operand.vmem [shape: f32[16,8], index: 1, kind: output, shape index: {}]  }
   0x1   :  { %v4_v0 = vld [vmem:[%s28_s0] ss:$0 sm:$0xff] }
   0x2   :  { %5 = vst [vmem:[%s29_s1] sm:$0xff] %v4_v0  ;;  %8 = vst [vmem:[%s29_s1 + $0x8] sm:$0xff] %v4_v0 }

// kernel: tile.49
= control target key start
LH: loop header
LB: loop body
LE: loop exit
PB: predicated region body
PF: predicated region fallthrough
CT: control target
= control target key end

     0   :  { %s133_s10 = smov 120   ;;  %s134_s11 = smov 104   ;;  %vm3_vm0 = vcmask 64512   ;;  %vm9_vm1 = vcmask 1048512   ;;  %vm15_vm2 = vcmask 982912   ;;  %vm21_vm3 = vcmask 917312   ;;  %s209_s0 = inlined_call_operand.vmem [shape: f32[16,8], index: 0, kind: input, shape index: {}]   ;;  %s210_s1 = inlined_call_operand.vmem [shape: f32[1,128], index: 1, kind: output, shape index: {}]  }
   0x1   :  { %v103_v0 = vld [vmem:[%s209_s0 + $0xf] sm:$0x1]   ;;  %v105_v1 = vld [vmem:[%s209_s0 + $0xd] sm:$0x1]   ;;  %v104_v2 = vld [vmem:[%s209_s0 + $0xe] sm:$0x1]  }
   0x2   :  { %7 = vrot.lane.b32.xlu0 %v103_v0, %s133_s10  ;;  %19 = vrot.lane.b32.xlu1 %v105_v1, %s134_s11  ;;  %v106_v3 = vld [vmem:[%s209_s0 + $0xc] sm:$0x1]   ;;  %s135_s16 = smov 112   ;;  %s136_s17 = smov 96   ;;  %v107_v4 = vld [vmem:[%s209_s0 + $0xb] sm:$0x1]  }
   0x3   :  { %v108_v5 = vld [vmem:[%s209_s0 + $0xa] sm:$0x1]   ;;  %v2_v6 = vld [vmem:[%s209_s0] sm:$0x1]   ;;  %s137_s24 = smov 88   ;;  %s138_s25 = smov 80  }
   0x4   :  { %4 = vst.msk [vmem:[#allocation0] sm:$0x1] %vm3_vm0, %v2_v6   ;;  %v109_v7 = vld [vmem:[%s209_s0 + $0x9] sm:$0x1]   ;;  %v110_v8 = vld [vmem:[%s209_s0 + $0x8] sm:$0x1]  }
   0x5   :  { %s139_s30 = smov 72   ;;  %s140_s2 = smov 64   ;;  %v111_v9 = vld [vmem:[%s209_s0 + $0x7] sm:$0x1]   ;;  %v112_v10 = vld [vmem:[%s209_s0 + $0x6] sm:$0x1]  }
   0x6   :  { %13 = vrot.lane.b32.xlu0 %v104_v2, %s135_s16  ;;  %25 = vrot.lane.b32.xlu1 %v106_v3, %s136_s17  ;;  %s141_s7 = smov 56   ;;  %s142_s8 = smov 48   ;;  %v113_v11 = vld [vmem:[%s209_s0 + $0x5] sm:$0x1]   ;;  %v114_v12 = vld [vmem:[%s209_s0 + $0x4] sm:$0x1]  }
   0x7   :  { %s143_s13 = smov 40   ;;  %s144_s14 = smov 32   ;;  %v115_v13 = vld [vmem:[%s209_s0 + $0x3] sm:$0x1]   ;;  %v116_v14 = vld [vmem:[%s209_s0 + $0x2] sm:$0x1]  }
   0x8   :  { %s145_s19 = smov 24   ;;  %s146_s20 = smov 16   ;;  %v117_v15 = vld [vmem:[%s209_s0 + $0x1] sm:$0x1]   ;;  %vm27_vm4 = vcmask 851712   ;;  %vm33_vm5 = vcmask 786112  }
   0x9   :  { %s147_s0 = smov 8   ;;  %vm39_vm6 = vcmask 720512   ;;  %vm45_vm7 = vcmask 654912   ;;  %vm51_vm8 = vcmask 589312   ;;  %vm57_vm9 = vcmask 523712  }
   0xa   :  { %31 = vrot.lane.b32.xlu0 %v107_v4, %s137_s24  ;;  %37 = vrot.lane.b32.xlu1 %v108_v5, %s138_s25  ;;  %vm63_vm10 = vcmask 458112   ;;  %vm69_vm11 = vcmask 392512   ;;  %vm75_vm12 = vcmask 326912   ;;  %vm81_vm13 = vcmask 261312  }
   0xb   :  { %vm87_vm14 = vcmask 195712   ;;  %vm93_vm15 = vcmask 130112  }
   0xe   :  { %43 = vrot.lane.b32.xlu0 %v109_v7, %s139_s30  ;;  %49 = vrot.lane.b32.xlu1 %v110_v8, %s140_s2 }
  0x12   :  { %55 = vrot.lane.b32.xlu0 %v111_v9, %s141_s7  ;;  %61 = vrot.lane.b32.xlu1 %v112_v10, %s142_s8 }
  0x16   :  { %67 = vrot.lane.b32.xlu0 %v113_v11, %s143_s13  ;;  %73 = vrot.lane.b32.xlu1 %v114_v12, %s144_s14 }
  0x1a   :  { %79 = vrot.lane.b32.xlu0 %v115_v13, %s145_s19  ;;  %85 = vrot.lane.b32.xlu1 %v116_v14, %s146_s20 }
  0x1e   :  { %91 = vrot.lane.b32.xlu0 %v117_v15, %s147_s0 }
  0x74   :  { %v8_v16 = vpop.permute.xlu0 %7   ;;  %v20_v17 = vpop.permute.xlu1 %19  }
  0x75   :  { %10 = vst.msk [vmem:[#allocation0] sm:$0x1] %vm9_vm1, %v8_v16  }
  0x78   :  { %v14_v18 = vpop.permute.xlu0 %13   ;;  %v26_v19 = vpop.permute.xlu1 %25  }
  0x79   :  { %16 = vst.msk [vmem:[#allocation0] sm:$0x1] %vm15_vm2, %v14_v18  }
  0x7a   :  { %22 = vst.msk [vmem:[#allocation0] sm:$0x1] %vm21_vm3, %v20_v17  }
  0x7b   :  { %28 = vst.msk [vmem:[#allocation0] sm:$0x1] %vm27_vm4, %v26_v19  }
  0x7c   :  { %v32_v20 = vpop.permute.xlu0 %31   ;;  %v38_v21 = vpop.permute.xlu1 %37  }
  0x7d   :  { %34 = vst.msk [vmem:[#allocation0] sm:$0x1] %vm33_vm5, %v32_v20  }
  0x7e   :  { %40 = vst.msk [vmem:[#allocation0] sm:$0x1] %vm39_vm6, %v38_v21  }
  0x80   :  { %v44_v22 = vpop.permute.xlu0 %43   ;;  %v50_v23 = vpop.permute.xlu1 %49  }
  0x81   :  { %46 = vst.msk [vmem:[#allocation0] sm:$0x1] %vm45_vm7, %v44_v22  }
  0x82   :  { %52 = vst.msk [vmem:[#allocation0] sm:$0x1] %vm51_vm8, %v50_v23  }
  0x84   :  { %v56_v24 = vpop.permute.xlu0 %55   ;;  %v62_v25 = vpop.permute.xlu1 %61  }
  0x85   :  { %58 = vst.msk [vmem:[#allocation0] sm:$0x1] %vm57_vm9, %v56_v24  }
  0x86   :  { %64 = vst.msk [vmem:[#allocation0] sm:$0x1] %vm63_vm10, %v62_v25  }
  0x88   :  { %v68_v26 = vpop.permute.xlu0 %67   ;;  %v74_v27 = vpop.permute.xlu1 %73  }
  0x89   :  { %70 = vst.msk [vmem:[#allocation0] sm:$0x1] %vm69_vm11, %v68_v26  }
  0x8a   :  { %76 = vst.msk [vmem:[#allocation0] sm:$0x1] %vm75_vm12, %v74_v27  }
  0x8c   :  { %v80_v28 = vpop.permute.xlu0 %79   ;;  %v86_v29 = vpop.permute.xlu1 %85  }
  0x8d   :  { %82 = vst.msk [vmem:[#allocation0] sm:$0x1] %vm81_vm13, %v80_v28  }
  0x8e   :  { %88 = vst.msk [vmem:[#allocation0] sm:$0x1] %vm87_vm14, %v86_v29  }
  0x90   :  { %v92_v30 = vpop.permute.xlu0 %91  }
  0x91   :  { %94 = vst.msk [vmem:[#allocation0] sm:$0x1] %vm93_vm15, %v92_v30  }
  0x98   :  { %v99_v31 = vld [vmem:[#allocation0] sm:$0x1] }
  0x99   :  { %102 = vst [vmem:[%s210_s1] sm:$0x1] %v99_v31 }

// kernel: easy_conv2d_forward.1
= control target key start
LH: loop header
LB: loop body
LE: loop exit
PB: predicated region body
PF: predicated region fallthrough
CT: control target
= control target key end

     0   :  { %v3327_v3 = vmov 0.0   ;;  %vm95_vm0 = vcmask 523264   ;;  %vm3328_vm1 = vmmov 0   ;;  %v286_v45 = vlaneseq  ;;  %s4710_s1 = inlined_call_operand.vmem [shape: f32[64,384], index: 1, kind: input, shape index: {}]   ;;  %s4711_s0 = inlined_call_operand.vmem [shape: f32[32,64], index: 0, kind: input, shape index: {}]   ;;  %s4712_s5 = inlined_call_operand.vmem [shape: f32[128,8], index: 5, kind: input, shape index: {}]   ;;  %s4713_s6 = inlined_call_operand.vmem [shape: f32[8,128], index: 6, kind: input, shape index: {}]   ;;  %s4714_s2 = inlined_call_operand.vmem [shape: f32[128,384], index: 2, kind: input, shape index: {}]   ;;  %s4715_s7 = inlined_call_operand.vmem [shape: f32[1,128], index: 7, kind: input, shape index: {}]   ;;  %s4716_s8 = inlined_call_operand.vmem [shape: f32[1,128], index: 8, kind: input, shape index: {}]   ;;  %s4717_s3 = inlined_call_operand.vmem [shape: f32[128,384], index: 3, kind: input, shape index: {}]   ;;  %s4718_s9 = inlined_call_operand.vmem [shape: f32[1,128], index: 9, kind: input, shape index: {}]   ;;  %s4719_s10 = inlined_call_operand.vmem [shape: f32[1,128], index: 10, kind: input, shape index: {}]   ;;  %s4720_s4 = inlined_call_operand.vmem [shape: f32[128,384], index: 4, kind: input, shape index: {}]   ;;  %s4721_s11 = inlined_call_operand.vmem [shape: f32[1,128], index: 11, kind: input, shape index: {}]   ;;  %s4722_s12 = inlined_call_operand.vmem [shape: f32[1,128], index: 12, kind: input, shape index: {}]   ;;  %s4723_s13 = inlined_call_operand.vmem [shape: f32[1,128], index: 13, kind: input, shape index: {}]   ;;  %s4724_s14 = inlined_call_operand.vmem [shape: f32[1,128], index: 14, kind: input, shape index: {}]   ;;  %s4725_s15 = inlined_call_operand.vmem [shape: f32[32,128], index: 15, kind: output, shape index: {}]  }
   0x1   :  { %v93_v0 = vld [vmem:[%s4710_s1 + $0xb0] sm:$0xff]  ;;  %v94_v1 = vld [vmem:[%s4710_s1 + $0xb8] sm:$0xff]  ;;  %v92_v2 = vld [vmem:[%s4710_s1 + $0xa8] sm:$0xff]  ;;  %172 = vmatprep.mubr.f32.mxu0 %v3327_v3  ;;  %vm473_vm8 = vcmask 64512  }
   0x2   :  { %124 = vmatprep.subr.mxu0 %v93_v0  ;;  %2844 = vmatprep.subr.mxu1 %v94_v1  ;;  %v90_v4 = vld [vmem:[%s4710_s1 + $0x98] sm:$0xff]  ;;  %v91_v5 = vld [vmem:[%s4710_s1 + $0xa0] sm:$0xff]  ;;  %v89_v6 = vld [vmem:[%s4710_s1 + $0x90] sm:$0xff]  ;;  %v3654_v46 = vshrl.u32 %v286_v45, 7 }
   0x3   :  { %125 = vmatpush1.msra.mxu0 %v92_v2  ;;  %2845 = vmatpush3.msra.mxu1 %v94_v1  ;;  %v87_v7 = vld [vmem:[%s4710_s1 + $0x80] sm:$0xff]  ;;  %v88_v8 = vld [vmem:[%s4710_s1 + $0x88] sm:$0xff]  ;;  %v86_v9 = vld [vmem:[%s4710_s1 + $0x78] sm:$0xff] }
   0x4   :  { %126 = vmatprep.subr.mxu0 %v90_v4  ;;  %2846 = vmatprep.subr.mxu1 %v91_v5  ;;  %v84_v10 = vld [vmem:[%s4710_s1 + $0x68] sm:$0xff]  ;;  %v85_v11 = vld [vmem:[%s4710_s1 + $0x70] sm:$0xff]  ;;  %v83_v12 = vld [vmem:[%s4710_s1 + $0x60] sm:$0xff]  ;;  %v318_v50 = vadd.s32 8, %v3654_v46  ;;  %v319_v53 = vadd.s32 16, %v3654_v46  ;;  %v325_v59 = vand.u32 15, %v3654_v46 }
   0x5   :  { %127 = vmatpush1.msra.mxu0 %v89_v6  ;;  %2847 = vmatpush3.msra.mxu1 %v91_v5  ;;  %v81_v13 = vld [vmem:[%s4710_s1 + $0x50] sm:$0xff]  ;;  %v82_v14 = vld [vmem:[%s4710_s1 + $0x58] sm:$0xff]  ;;  %v80_v15 = vld [vmem:[%s4710_s1 + $0x48] sm:$0xff]  ;;  %v320_v60 = vadd.s32 24, %v3654_v46  ;;  %vm288_vm2 = vcmp.lt.s32.totalorder %v3654_v46, 1  ;;  %vm297_vm3 = vcmp.lt.s32.totalorder %v3654_v46, 7 }
   0x6   :  { %128 = vmatprep.subr.mxu0 %v87_v7  ;;  %2848 = vmatprep.subr.mxu1 %v88_v8  ;;  %v78_v16 = vld [vmem:[%s4710_s1 + $0x38] sm:$0xff]  ;;  %v79_v17 = vld [vmem:[%s4710_s1 + $0x40] sm:$0xff]  ;;  %v77_v18 = vld [vmem:[%s4710_s1 + $0x30] sm:$0xff]  ;;  %v332_v56 = vand.u32 15, %v318_v50  ;;  %v339_v0 = vand.u32 15, %v319_v53  ;;  %vm3668_vm5 = vcmp.eq.s32.totalorder %v325_v59, 0 }
   0x7   :  { %129 = vmatpush1.msra.mxu0 %v86_v9  ;;  %2849 = vmatpush3.msra.mxu1 %v88_v8  ;;  %v75_v19 = vld [vmem:[%s4710_s1 + $0x20] sm:$0xff]  ;;  %v76_v20 = vld [vmem:[%s4710_s1 + $0x28] sm:$0xff]  ;;  %v74_v21 = vld [vmem:[%s4710_s1 + $0x18] sm:$0xff] }
   0x8   :  { %130 = vmatprep.subr.mxu0 %v84_v10  ;;  %2850 = vmatprep.subr.mxu1 %v85_v11  ;;  %v72_v22 = vld [vmem:[%s4710_s1 + $0x8] sm:$0xff]  ;;  %v73_v23 = vld [vmem:[%s4710_s1 + $0x10] sm:$0xff]  ;;  %v71_v24 = vld [vmem:[%s4710_s1] sm:$0xff]  ;;  %vm3662_vm4 = vcmp.eq.s32.totalorder %v332_v56, 15  ;;  %vm3674_vm6 = vcmp.eq.s32.totalorder %v339_v0, 0 }
   0x9   :  { %131 = vmatpush1.msra.mxu0 %v83_v12  ;;  %2851 = vmatpush3.msra.mxu1 %v85_v11  ;;  %v67_v25 = vld [vmem:[%s4711_s0] sm:$0xff]  ;;  %v68_v26 = vld [vmem:[%s4711_s0 + $0x8] sm:$0xff]  ;;  %v69_v27 = vld [vmem:[%s4711_s0 + $0x10] sm:$0xff]  ;;  %v346_v11 = vand.u32 15, %v320_v60 }
   0xa   :  { %132 = vmatprep.subr.mxu0 %v81_v13  ;;  %2852 = vmatprep.subr.mxu1 %v82_v14  ;;  %v70_v28 = vld [vmem:[%s4711_s0 + $0x18] sm:$0xff]  ;;  %v3518_v30 = vld [vmem:[%s4712_s5 + $0x70] sm:$0xff]  ;;  %v3527_v31 = vld [vmem:[%s4712_s5 + $0x68] sm:$0xff] }
   0xb   :  { %133 = vmatpush1.msra.mxu0 %v80_v15  ;;  %2853 = vmatpush3.msra.mxu1 %v82_v14  ;;  %v3510_v29 = vld [vmem:[%s4712_s5 + $0x78] sm:$0xff]  ;;  %v3536_v32 = vld [vmem:[%s4712_s5 + $0x60] sm:$0xff]  ;;  %v3554_v34 = vld [vmem:[%s4712_s5 + $0x50] sm:$0xff]  ;;  %vm3700_vm7 = vcmp.eq.s32.totalorder %v346_v11, 15 }
   0xc   :  { %134 = vmatprep.subr.mxu0 %v78_v16  ;;  %2854 = vmatprep.subr.mxu1 %v79_v17  ;;  %v3545_v33 = vld [vmem:[%s4712_s5 + $0x58] sm:$0xff]  ;;  %v3563_v35 = vld [vmem:[%s4712_s5 + $0x48] sm:$0xff]  ;;  %v3572_v36 = vld [vmem:[%s4712_s5 + $0x40] sm:$0xff] }
   0xd   :  { %135 = vmatpush1.msra.mxu0 %v77_v18  ;;  %2855 = vmatpush3.msra.mxu1 %v79_v17  ;;  %v3581_v37 = vld [vmem:[%s4712_s5 + $0x38] sm:$0xff]  ;;  %v3590_v38 = vld [vmem:[%s4712_s5 + $0x30] sm:$0xff]  ;;  %v3599_v39 = vld [vmem:[%s4712_s5 + $0x28] sm:$0xff] }
   0xe   :  { %136 = vmatprep.subr.mxu0 %v75_v19  ;;  %2856 = vmatprep.subr.mxu1 %v76_v20  ;;  %v3608_v40 = vld [vmem:[%s4712_s5 + $0x20] sm:$0xff]  ;;  %v3617_v41 = vld [vmem:[%s4712_s5 + $0x18] sm:$0xff]  ;;  %v3626_v42 = vld [vmem:[%s4712_s5 + $0x10] sm:$0xff] }
   0xf   :  { %137 = vmatpush1.msra.mxu0 %v74_v21  ;;  %2857 = vmatpush3.msra.mxu1 %v76_v20  ;;  %v3635_v43 = vld [vmem:[%s4712_s5 + $0x8] sm:$0xff]  ;;  %v3642_v44 = vld [vmem:[%s4712_s5] sm:$0xff] }
  0x10   :  { %138 = vmatprep.subr.mxu0 %v72_v22  ;;  %2858 = vmatprep.subr.mxu1 %v73_v23 }
  0x11   :  { %139 = vmatpush1.msra.mxu0 %v71_v24  ;;  %2859 = vmatpush3.msra.mxu1 %v73_v23 }
  0x12   :  { %2860 = vmatprep.mubr.msk.f32.mxu1 %vm95_vm0, %v67_v25  ;;  %2600 = vmatmul.mubr.msk.f32.vlgmr.msra.gmra.mxu0 %vm95_vm0, %v67_v25 }
  0x13   :  { %2861 = vmatmul.mubr.msk.f32.vlgmr.msra.gmra.mxu1 %vm95_vm0, %v68_v26  ;;  %178 = vmatprep.mubr.f32.mxu0 %v3327_v3 }
  0x14   :  { %2863 = vmatprep.mubr.msk.f32.mxu1 %vm95_vm0, %v69_v27  ;;  %2866 = vmatprep.subr.mxu0 %v3327_v3 }
  0x15   :  { %2906 = vmatprep.subr.mxu1 %v3327_v3  ;;  %2867 = vmatpush3.msra.mxu0 %v3510_v29 }
  0x16   :  { %2601 = vmatmul.mubr.msk.f32.gmra.mxu0 %vm95_vm0, %v68_v26  ;;  %2907 = vmatpush3.msra.mxu1 %v3510_v29 }
  0x17   :  { %2864 = vmatmul.mubr.msk.f32.gmra.mxu1 %vm95_vm0, %v70_v28  ;;  %184 = vmatprep.mubr.f32.mxu0 %v3327_v3 }
  0x18   :  { %2868 = vmatprep.subr.mxu0 %v3327_v3  ;;  %2908 = vmatprep.subr.mxu1 %v3327_v3 }
  0x19   :  { %2869 = vmatpush3.msra.mxu0 %v3518_v30  ;;  %2909 = vmatpush3.msra.mxu1 %v3518_v30 }
  0x1a   :  { %2602 = vmatmul.mubr.msk.f32.gmra.mxu0 %vm95_vm0, %v69_v27  ;;  %2870 = vmatprep.subr.mxu0 %v3327_v3 }
  0x1b   :  { %190 = vmatprep.mubr.f32.mxu0 %v3327_v3  ;;  %2910 = vmatprep.subr.mxu1 %v3327_v3 }
  0x1c   :  { %2871 = vmatpush3.msra.mxu0 %v3527_v31  ;;  %2911 = vmatpush3.msra.mxu1 %v3527_v31 }
  0x1d   :  { %2872 = vmatprep.subr.mxu0 %v3327_v3  ;;  %2912 = vmatprep.subr.mxu1 %v3327_v3 }
  0x1e   :  { %2603 = vmatmul.mubr.msk.f32.gmra.mxu0 %vm95_vm0, %v70_v28  ;;  %2913 = vmatpush3.msra.mxu1 %v3536_v32 }
  0x1f   :  { %2873 = vmatpush3.msra.mxu0 %v3536_v32  ;;  %2914 = vmatprep.subr.mxu1 %v3327_v3 }
  0x20   :  { %2874 = vmatprep.subr.mxu0 %v3327_v3  ;;  %2915 = vmatpush3.msra.mxu1 %v3545_v33 }
  0x21   :  { %2875 = vmatpush3.msra.mxu0 %v3545_v33  ;;  %2916 = vmatprep.subr.mxu1 %v3327_v3 }
  0x22   :  { %2876 = vmatprep.subr.mxu0 %v3327_v3  ;;  %2917 = vmatpush3.msra.mxu1 %v3554_v34 }
  0x23   :  { %2877 = vmatpush3.msra.mxu0 %v3554_v34  ;;  %2918 = vmatprep.subr.mxu1 %v3327_v3 }
  0x24   :  { %2878 = vmatprep.subr.mxu0 %v3327_v3  ;;  %2919 = vmatpush3.msra.mxu1 %v3563_v35 }
  0x25   :  { %2879 = vmatpush3.msra.mxu0 %v3563_v35  ;;  %2920 = vmatprep.subr.mxu1 %v3327_v3 }
  0x26   :  { %2880 = vmatprep.subr.mxu0 %v3327_v3  ;;  %2921 = vmatpush3.msra.mxu1 %v3572_v36 }
  0x27   :  { %2881 = vmatpush3.msra.mxu0 %v3572_v36  ;;  %2922 = vmatprep.subr.mxu1 %v3327_v3 }
  0x28   :  { %2882 = vmatprep.subr.mxu0 %v3327_v3  ;;  %2923 = vmatpush3.msra.mxu1 %v3581_v37 }
  0x29   :  { %2883 = vmatpush3.msra.mxu0 %v3581_v37  ;;  %2924 = vmatprep.subr.mxu1 %v3327_v3 }
  0x2a   :  { %2884 = vmatprep.subr.mxu0 %v3327_v3  ;;  %2925 = vmatpush3.msra.mxu1 %v3590_v38 }
  0x2b   :  { %2885 = vmatpush3.msra.mxu0 %v3590_v38  ;;  %2926 = vmatprep.subr.mxu1 %v3327_v3 }
  0x2c   :  { %2886 = vmatprep.subr.mxu0 %v3327_v3  ;;  %2927 = vmatpush3.msra.mxu1 %v3599_v39 }
  0x2d   :  { %2887 = vmatpush3.msra.mxu0 %v3599_v39  ;;  %2928 = vmatprep.subr.mxu1 %v3327_v3 }
  0x2e   :  { %2888 = vmatprep.subr.mxu0 %v3327_v3  ;;  %2929 = vmatpush3.msra.mxu1 %v3608_v40 }
  0x2f   :  { %2889 = vmatpush3.msra.mxu0 %v3608_v40  ;;  %2930 = vmatprep.subr.mxu1 %v3327_v3 }
  0x30   :  { %2890 = vmatprep.subr.mxu0 %v3327_v3  ;;  %2931 = vmatpush3.msra.mxu1 %v3617_v41 }
  0x31   :  { %2891 = vmatpush3.msra.mxu0 %v3617_v41  ;;  %2932 = vmatprep.subr.mxu1 %v3327_v3 }
  0x32   :  { %2892 = vmatprep.subr.mxu0 %v3327_v3  ;;  %2933 = vmatpush3.msra.mxu1 %v3626_v42 }
  0x33   :  { %2893 = vmatpush3.msra.mxu0 %v3626_v42  ;;  %2934 = vmatprep.subr.mxu1 %v3327_v3 }
  0x34   :  { %2894 = vmatprep.subr.mxu0 %v3327_v3  ;;  %2935 = vmatpush3.msra.mxu1 %v3635_v43 }
  0x35   :  { %2895 = vmatpush3.msra.mxu0 %v3635_v43  ;;  %2898 = vmatprep.mubr.msk.f32.mxu0 %vm3328_vm1, %v3327_v3 }
  0x36   :  { %2896 = vmatprep.subr.mxu0 %v3327_v3  ;;  %2936 = vmatprep.subr.mxu1 %v3327_v3 }
  0x37   :  { %2897 = vmatpush3.msra.mxu0 %v3642_v44  ;;  %2937 = vmatpush3.msra.mxu1 %v3642_v44 }
  0x38   :  { %2901 = vmatprep.subr.mxu0 %v3327_v3  ;;  %2938 = vmatprep.mubr.msk.f32.mxu1 %vm3328_vm1, %v3327_v3 }
  0xd2   :  { %v174_v47 = vpop.f32.mrf.mxu0 }
  0xd3   :  { %v2862_v48 = vpop.f32.mrf.mxu1  ;;  %v282_v1 = vrot.slane %v174_v47, 7  ;;  %v293_v12 = vrot.slane %v174_v47, 1 }
  0xd4   :  { %v176_v49 = vpop.f32.mrf.mxu0  ;;  %v311_v61 = vrot.slane %v2862_v48, 7  ;;  %v303_v2 = vrot.slane %v2862_v48, 1 }
  0xd5   :  { %v263_v51 = vpop.f32.mrf.mxu1 }
  0xd6   :  { %v180_v52 = vpop.f32.mrf.mxu0  ;;  %v310_v62 = vrot.slane %v263_v51, 7  ;;  %v302_v13 = vrot.slane %v263_v51, 1 }
  0xd7   :  { %v2865_v54 = vpop.f32.mrf.mxu1  ;;  %v283_v57 = vrot.slane %v180_v52, 7  ;;  %v294_v5 = vrot.slane %v180_v52, 1 }
  0xd8   :  { %v182_v55 = vpop.f32.mrf.mxu0  ;;  %v316_v14 = vsel %vm288_vm2, %v310_v62, %v311_v61  ;;  %v305_v22 = vrot.slane %v2865_v54, 1  ;;  %v313_v23 = vrot.slane %v2865_v54, 7  ;;  %v308_v54 = vsel %vm297_vm3, %v302_v13, %v303_v2 }
  0xd9   :  { %v273_v58 = vpop.f32.mrf.mxu1  ;;  %v291_v8 = vsel %vm288_vm2, %v282_v1, %v283_v57  ;;  %v300_v21 = vsel %vm297_vm3, %v293_v12, %v294_v5 }
  0xda   :  { %v186_v63 = vpop.f32.mrf.mxu0  ;;  %v304_v4 = vrot.slane %v273_v58, 1  ;;  %v378_v24 = vadd.f32 %v291_v8, %v182_v55  ;;  %v312_v25 = vrot.slane %v273_v58, 7  ;;  %v309_v55 = vsel %vm297_vm3, %v305_v22, %v302_v13  ;;  %v3713_v13 = vld [vmem:[%s4713_s6] sm:$0xff] }
  0xdb   :  { %v284_v9 = vrot.slane %v186_v63, 7  ;;  %v295_v18 = vrot.slane %v186_v63, 1 }
  0xdc   :  { %v188_v7 = vpop.f32.mrf.mxu0  ;;  %v307_v17 = vsel %vm297_vm3, %v303_v2, %v304_v4  ;;  %v314_v58 = vsel %vm288_vm2, %v312_v25, %v313_v23 }
  0xdd   :  { %v290_v26 = vsel %vm288_vm2, %v283_v57, %v284_v9  ;;  %v386_v45 = vsel %vm3662_vm4, %v316_v14, %v307_v17  ;;  %v388_v63 = vsel %vm3700_vm7, %v314_v58, %v309_v55  ;;  %v3724_v17 = vsub.s32 0, %v3654_v46  ;;  %v787_v58 = vld [vmem:[%s4714_s2 + $0x178] sm:$0xff] }
  0xde   :  { %v192_v15 = vpop.f32.mrf.mxu0  ;;  %v390_v57 = vadd.f32 %v386_v45, %v378_v24  ;;  %2946 = vmatprep.subr.mxu1 %v787_v58 }
  0xdf   :  { %v285_v19 = vrot.slane %v192_v15, 7  ;;  %v296_v20 = vrot.slane %v192_v15, 1 }
  0xe0   :  { %v194_v50 = vpop.f32.mrf.mxu0 }
  0xe1   :  { %v292_v27 = vsel %vm288_vm2, %v285_v19, %v282_v1  ;;  %v298_v28 = vsel %vm297_vm3, %v295_v18, %v296_v20  ;;  %v289_v51 = vsel %vm288_vm2, %v284_v9, %v285_v19 }
  0xe2   :  { %v373_v47 = vsel %vm3668_vm5, %v300_v21, %v292_v27  ;;  %v375_v48 = vsel %vm3674_vm6, %v298_v28, %v290_v26  ;;  %v380_v59 = vadd.f32 %v289_v51, %v194_v50 }
  0xe3   :  { %v377_v52 = vadd.f32 %v373_v47, %v176_v49  ;;  %v379_v53 = vadd.f32 %v375_v48, %v188_v7  ;;  %v306_v49 = vsel %vm297_vm3, %v304_v4, %v305_v22 }
  0xe4   :  { %v392_v0 = vadd.f32 %v388_v63, %v380_v59  ;;  %v784_v59 = vld [vmem:[%s4714_s2 + $0x160] sm:$0xff]  ;;  %v783_v63 = vld [vmem:[%s4714_s2 + $0x158] sm:$0xff] }
  0xe5   :  { %v389_v60 = vadd.f32 %v377_v52, %v308_v54  ;;  %v391_v61 = vadd.f32 %v379_v53, %v306_v49 }
  0xe7   :  { %v393_v62 = vadd.f32 %v390_v57, %v389_v60 }
  0xe9   :  { %v394_v1 = vadd.f32 %v393_v62, %v391_v61 }
  0xeb   :  { %v395_v2 = vadd.f32 %v394_v1, %v392_v0  ;;  %v780_v1 = vld [vmem:[%s4714_s2 + $0x140] sm:$0xff] }
  0xed   :  { %v396_v5 = vrot.slane %v395_v2, 4 }
  0xef   :  { %v397_v7 = vadd.f32 %v396_v5, %v395_v2  ;;  %v779_v2 = vld [vmem:[%s4714_s2 + $0x138] sm:$0xff]  ;;  %v781_v5 = vld [vmem:[%s4714_s2 + $0x148] sm:$0xff] }
  0xf1   :  { %v398_v8 = vrot.slane %v397_v7, 2 }
  0xf3   :  { %v399_v9 = vadd.f32 %v398_v8, %v397_v7  ;;  %v777_v7 = vld [vmem:[%s4714_s2 + $0x128] sm:$0xff]  ;;  %v776_v8 = vld [vmem:[%s4714_s2 + $0x120] sm:$0xff] }
  0xf5   :  { %v400_v11 = vrot.slane %v399_v9, 1 }
  0xf7   :  { %v401_v12 = vadd.f32 %v400_v11, %v399_v9  ;;  %v778_v9 = vld [vmem:[%s4714_s2 + $0x130] sm:$0xff] }
  0xf8   :  { %v774_v11 = vld [vmem:[%s4714_s2 + $0x110] sm:$0xff] }
  0xf9   :  { %2899 = vmatmul.mubr.f32.vlgmr.msra.gmra.mxu0 %v401_v12  ;;  %v773_v12 = vld [vmem:[%s4714_s2 + $0x108] sm:$0xff] }
  0xfa   :  { %2902 = vmatpush3.msra.mxu0 %v3713_v13  ;;  %2903 = vmatprep.mubr.msk.f32.mxu0 %vm3328_vm1, %v3327_v3 }
  0xfb   :  { %2941 = vmatprep.subr.mxu0 %v3327_v3 }
 0x1b9   :  { %v468_v4 = vpop.f32.mrf.mxu0 }
 0x1ba   :  { %v472_v14 = vmul.f32 0.001953125, %v468_v4  ;;  %v775_v4 = vld [vmem:[%s4714_s2 + $0x118] sm:$0xff] }
 0x1bb   :  { %v2900_v15 = vpop.f32.mrf.mxu0 }
 0x1bc   :  { %2904 = vmatmul.mubr.msk.f32.vlgmr.msra.gmra.mxu0 %vm473_vm8, %v472_v14  ;;  %v771_v14 = vld [vmem:[%s4714_s2 + $0xf8] sm:$0xff]  ;;  %v770_v15 = vld [vmem:[%s4714_s2 + $0xf0] sm:$0xff] }
 0x1bd   :  { %2942 = vmatpush3.msra.mxu0 %v3713_v13  ;;  %2943 = vmatprep.mubr.msk.f32.mxu0 %vm3328_vm1, %v3327_v3 }
 0x27c   :  { %v543_v18 = vpop.f32.mrf.mxu0 }
 0x27d   :  { %v550_v19 = vrot.slane %v543_v18, %v3724_v17  ;;  %v772_v18 = vld [vmem:[%s4714_s2 + $0x100] sm:$0xff] }
 0x27e   :  { %v2905_v20 = vpop.f32.mrf.mxu0 }
 0x27f   :  { %v3727_v21 = vsub.f32 %v389_v60, %v550_v19  ;;  %v3729_v22 = vsub.f32 %v390_v57, %v550_v19  ;;  %v3731_v23 = vsub.f32 %v391_v61, %v550_v19  ;;  %v3733_v24 = vsub.f32 %v392_v0, %v550_v19  ;;  %v786_v57 = vld [vmem:[%s4714_s2 + $0x170] sm:$0xff]  ;;  %v785_v61 = vld [vmem:[%s4714_s2 + $0x168] sm:$0xff]  ;;  %v768_v19 = vld [vmem:[%s4714_s2 + $0xe0] sm:$0xff] }
 0x280   :  { %788 = vmatprep.subr.mxu0 %v786_v57  ;;  %v782_v0 = vld [vmem:[%s4714_s2 + $0x150] sm:$0xff]  ;;  %v767_v20 = vld [vmem:[%s4714_s2 + $0xd8] sm:$0xff]  ;;  %v753_v57 = vld [vmem:[%s4714_s2 + $0x68] sm:$0xff] }
 0x281   :  { %v555_v25 = vmul.f32 %v3727_v21, %v3727_v21  ;;  %v556_v26 = vmul.f32 %v3729_v22, %v3729_v22  ;;  %v557_v27 = vmul.f32 %v3731_v23, %v3731_v23  ;;  %v558_v45 = vmul.f32 %v3733_v24, %v3733_v24 }
 0x283   :  { %v559_v28 = vadd.f32 %v556_v26, %v555_v25  ;;  %v769_v25 = vld [vmem:[%s4714_s2 + $0xe8] sm:$0xff] }
 0x284   :  { %v765_v26 = vld [vmem:[%s4714_s2 + $0xc8] sm:$0xff] }
 0x285   :  { %v560_v47 = vadd.f32 %v559_v28, %v557_v27  ;;  %v764_v27 = vld [vmem:[%s4714_s2 + $0xc0] sm:$0xff]  ;;  %v766_v28 = vld [vmem:[%s4714_s2 + $0xd0] sm:$0xff] }
 0x287   :  { %v561_v48 = vadd.f32 %v560_v47, %v558_v45  ;;  %v762_v45 = vld [vmem:[%s4714_s2 + $0xb0] sm:$0xff]  ;;  %v761_v47 = vld [vmem:[%s4714_s2 + $0xa8] sm:$0xff] }
 0x289   :  { %v562_v50 = vrot.slane %v561_v48, 4 }
 0x28b   :  { %v563_v51 = vadd.f32 %v562_v50, %v561_v48  ;;  %v763_v48 = vld [vmem:[%s4714_s2 + $0xb8] sm:$0xff] }
 0x28c   :  { %v759_v50 = vld [vmem:[%s4714_s2 + $0x98] sm:$0xff] }
 0x28d   :  { %v564_v52 = vrot.slane %v563_v51, 2 }
 0x28f   :  { %v565_v53 = vadd.f32 %v564_v52, %v563_v51  ;;  %v758_v51 = vld [vmem:[%s4714_s2 + $0x90] sm:$0xff]  ;;  %v760_v52 = vld [vmem:[%s4714_s2 + $0xa0] sm:$0xff] }
 0x291   :  { %v566_v54 = vrot.slane %v565_v53, 1 }
 0x293   :  { %v567_v55 = vadd.f32 %v566_v54, %v565_v53  ;;  %v756_v53 = vld [vmem:[%s4714_s2 + $0x80] sm:$0xff]  ;;  %v755_v54 = vld [vmem:[%s4714_s2 + $0x78] sm:$0xff] }
 0x295   :  { %2939 = vmatmul.mubr.f32.vlgmr.msra.gmra.mxu1 %v567_v55  ;;  %v757_v55 = vld [vmem:[%s4714_s2 + $0x88] sm:$0xff] }
 0x296   :  { %2947 = vmatpush3.msra.mxu1 %v787_v58  ;;  %v752_v58 = vld [vmem:[%s4714_s2 + $0x60] sm:$0xff] }
 0x297   :  { %2948 = vmatprep.subr.mxu1 %v784_v59 }
 0x298   :  { %2949 = vmatpush3.msra.mxu1 %v784_v59  ;;  %v754_v59 = vld [vmem:[%s4714_s2 + $0x70] sm:$0xff] }
 0x299   :  { %2950 = vmatprep.subr.mxu1 %v781_v5 }
 0x29a   :  { %2951 = vmatpush3.msra.mxu1 %v781_v5  ;;  %v745_v5 = vld [vmem:[%s4714_s2 + $0x28] sm:$0xff] }
 0x29b   :  { %2952 = vmatprep.subr.mxu1 %v778_v9 }
 0x29c   :  { %2953 = vmatpush3.msra.mxu1 %v778_v9  ;;  %v742_v9 = vld [vmem:[%s4714_s2 + $0x10] sm:$0xff] }
 0x29d   :  { %2954 = vmatprep.subr.mxu1 %v775_v4 }
 0x29e   :  { %2955 = vmatpush3.msra.mxu1 %v775_v4 }
 0x29f   :  { %2956 = vmatprep.subr.mxu1 %v772_v18 }
 0x2a0   :  { %2957 = vmatpush3.msra.mxu1 %v772_v18 }
 0x2a1   :  { %2958 = vmatprep.subr.mxu1 %v769_v25 }
 0x2a2   :  { %2959 = vmatpush3.msra.mxu1 %v769_v25 }
 0x2a3   :  { %2960 = vmatprep.subr.mxu1 %v766_v28 }
 0x2a4   :  { %2961 = vmatpush3.msra.mxu1 %v766_v28 }
 0x2a5   :  { %2962 = vmatprep.subr.mxu1 %v763_v48 }
 0x2a6   :  { %2963 = vmatpush3.msra.mxu1 %v763_v48 }
 0x2a7   :  { %2964 = vmatprep.subr.mxu1 %v760_v52 }
 0x2a8   :  { %2965 = vmatpush3.msra.mxu1 %v760_v52 }
 0x2a9   :  { %2966 = vmatprep.subr.mxu1 %v757_v55 }
 0x2aa   :  { %2967 = vmatpush3.msra.mxu1 %v757_v55 }
 0x2ab   :  { %2968 = vmatprep.subr.mxu1 %v754_v59 }
 0x2ac   :  { %2969 = vmatpush3.msra.mxu1 %v754_v59 }
 0x355   :  { %v634_v60 = vpop.f32.mrf.mxu1 }
 0x356   :  { %v638_v49 = vmul.f32 0.001953125, %v634_v60  ;;  %v750_v60 = vld [vmem:[%s4714_s2 + $0x50] sm:$0xff] }
 0x357   :  { %v2940_v62 = vpop.f32.mrf.mxu1 }
 0x358   :  { %2944 = vmatmul.mubr.msk.f32.vlgmr.msra.gmra.mxu0 %vm473_vm8, %v638_v49  ;;  %v749_v49 = vld [vmem:[%s4714_s2 + $0x48] sm:$0xff]  ;;  %v747_v62 = vld [vmem:[%s4714_s2 + $0x38] sm:$0xff] }
 0x359   :  { %789 = vmatpush1.msra.mxu0 %v785_v61  ;;  %852 = vmatprep.mubr.f32.mxu0 %v3327_v3  ;;  %v751_v61 = vld [vmem:[%s4714_s2 + $0x58] sm:$0xff] }
 0x35a   :  { %790 = vmatprep.subr.mxu0 %v783_v63  ;;  %v746_v63 = vld [vmem:[%s4714_s2 + $0x30] sm:$0xff]  ;;  %2970 = vmatprep.subr.mxu1 %v751_v61 }
 0x35b   :  { %791 = vmatpush1.msra.mxu0 %v782_v0  ;;  %v748_v0 = vld [vmem:[%s4714_s2 + $0x40] sm:$0xff]  ;;  %2971 = vmatpush3.msra.mxu1 %v751_v61 }
 0x35c   :  { %792 = vmatprep.subr.mxu0 %v780_v1  ;;  %v744_v1 = vld [vmem:[%s4714_s2 + $0x20] sm:$0xff]  ;;  %2972 = vmatprep.subr.mxu1 %v748_v0 }
 0x35d   :  { %793 = vmatpush1.msra.mxu0 %v779_v2  ;;  %v743_v2 = vld [vmem:[%s4714_s2 + $0x18] sm:$0xff]  ;;  %2973 = vmatpush3.msra.mxu1 %v748_v0 }
 0x35e   :  { %794 = vmatprep.subr.mxu0 %v777_v7  ;;  %v741_v7 = vld [vmem:[%s4714_s2 + $0x8] sm:$0xff]  ;;  %2974 = vmatprep.subr.mxu1 %v745_v5 }
 0x35f   :  { %795 = vmatpush1.msra.mxu0 %v776_v8  ;;  %v740_v8 = vld [vmem:[%s4714_s2] sm:$0xff]  ;;  %2975 = vmatpush3.msra.mxu1 %v745_v5 }
 0x360   :  { %796 = vmatprep.subr.mxu0 %v774_v11  ;;  %2976 = vmatprep.subr.mxu1 %v742_v9 }
 0x361   :  { %797 = vmatpush1.msra.mxu0 %v773_v12  ;;  %2977 = vmatpush3.msra.mxu1 %v742_v9 }
 0x362   :  { %798 = vmatprep.subr.mxu0 %v771_v14  ;;  %3019 = vmatprep.subr.mxu1 %v3327_v3  ;;  %v639_v14 = vld [vmem:[%s4715_s7] sm:$0x1] }
 0x363   :  { %799 = vmatpush1.msra.mxu0 %v770_v15 }
 0x364   :  { %800 = vmatprep.subr.mxu0 %v768_v19 }
 0x365   :  { %801 = vmatpush1.msra.mxu0 %v767_v20  ;;  %v2610_v20 = vld [vmem:[%s4716_s8] ss:$0 sm:$0xff] }
 0x366   :  { %802 = vmatprep.subr.mxu0 %v765_v26 }
 0x367   :  { %803 = vmatpush1.msra.mxu0 %v764_v27 }
 0x368   :  { %804 = vmatprep.subr.mxu0 %v762_v45 }
 0x369   :  { %805 = vmatpush1.msra.mxu0 %v761_v47 }
 0x36a   :  { %806 = vmatprep.subr.mxu0 %v759_v50 }
 0x36b   :  { %807 = vmatpush1.msra.mxu0 %v758_v51 }
 0x36c   :  { %808 = vmatprep.subr.mxu0 %v756_v53 }
 0x36d   :  { %809 = vmatpush1.msra.mxu0 %v755_v54 }
 0x36e   :  { %810 = vmatprep.subr.mxu0 %v753_v57 }
 0x36f   :  { %811 = vmatpush1.msra.mxu0 %v752_v58 }
 0x370   :  { %812 = vmatprep.subr.mxu0 %v750_v60 }
 0x371   :  { %813 = vmatpush1.msra.mxu0 %v749_v49 }
 0x372   :  { %814 = vmatprep.subr.mxu0 %v747_v62 }
 0x373   :  { %815 = vmatpush1.msra.mxu0 %v746_v63 }
 0x374   :  { %816 = vmatprep.subr.mxu0 %v744_v1 }
 0x375   :  { %817 = vmatpush1.msra.mxu0 %v743_v2 }
 0x376   :  { %818 = vmatprep.subr.mxu0 %v741_v7 }
 0x377   :  { %819 = vmatpush1.msra.mxu0 %v740_v8 }
 0x378   :  { %2984 = vmatprep.subr.mxu0 %v3327_v3 }
 0x418   :  { %v709_v11 = vpop.f32.mrf.mxu0 }
 0x419   :  { %v710_v12 = vadd.f32 1e-05, %v709_v11 }
 0x41a   :  { %v2945_v4 = vpop.f32.mrf.mxu0 }
 0x41b   :  { %3302 = vrsqrt.f32 %v710_v12 }
 0x428   :  { %v3303_v15 = vpop.eup %3302 }
 0x429   :  { %v714_v18 = vmul.f32 %v3303_v15, %v639_v14 }
 0x42b   :  { %v719_v19 = vrot.slane %v714_v18, %v3724_v17 }
 0x42d   :  { %v721_v25 = vmul.f32 %v719_v19, %v3727_v21  ;;  %v722_v26 = vmul.f32 %v719_v19, %v3729_v22  ;;  %v723_v27 = vmul.f32 %v719_v19, %v3731_v23  ;;  %v724_v28 = vmul.f32 %v719_v19, %v3733_v24 }
 0x42f   :  { %v732_v45 = vadd.f32 %v2610_v20, %v721_v25  ;;  %v733_v47 = vadd.f32 %v2610_v20, %v722_v26  ;;  %v734_v48 = vadd.f32 %v2610_v20, %v723_v27  ;;  %v735_v52 = vadd.f32 %v2610_v20, %v724_v28 }
 0x431   :  { %v3902_v50 = vmax.f32 %v732_v45, 0.0  ;;  %v3904_v51 = vmax.f32 %v733_v47, 0.0  ;;  %v3908_v53 = vmax.f32 %v734_v48, 0.0  ;;  %v3914_v21 = vmax.f32 %v735_v52, 0.0 }
 0x433   :  { %853 = vmatmul.mubr.f32.vlgmr.msra.gmra.mxu0 %v3902_v50  ;;  %2978 = vmatprep.mubr.f32.mxu1 %v3902_v50 }
 0x434   :  { %2979 = vmatmul.mubr.f32.vlgmr.msra.gmra.mxu1 %v3904_v51  ;;  %858 = vmatprep.mubr.f32.mxu0 %v3327_v3 }
 0x435   :  { %2981 = vmatprep.mubr.f32.mxu1 %v3908_v53  ;;  %2985 = vmatpush3.msra.mxu0 %v3510_v29 }
 0x436   :  { %2986 = vmatprep.subr.mxu0 %v3327_v3  ;;  %3020 = vmatpush3.msra.mxu1 %v3713_v13 }
 0x437   :  { %859 = vmatmul.mubr.f32.gmra.mxu0 %v3904_v51  ;;  %3024 = vmatprep.subr.mxu1 %v3327_v3 }
 0x438   :  { %2982 = vmatmul.mubr.f32.gmra.mxu1 %v3914_v21  ;;  %864 = vmatprep.mubr.f32.mxu0 %v3327_v3 }
 0x439   :  { %2987 = vmatpush3.msra.mxu0 %v3518_v30  ;;  %3021 = vmatprep.mubr.msk.f32.mxu1 %vm3328_vm1, %v3327_v3 }
 0x43a   :  { %2988 = vmatprep.subr.mxu0 %v3327_v3 }
 0x43b   :  { %865 = vmatmul.mubr.f32.gmra.mxu0 %v3908_v53 }
 0x43c   :  { %870 = vmatprep.mubr.f32.mxu0 %v3327_v3  ;;  %2989 = vmatpush3.msra.mxu0 %v3527_v31 }
 0x43d   :  { %2990 = vmatprep.subr.mxu0 %v3327_v3 }
 0x43e   :  { %2991 = vmatpush3.msra.mxu0 %v3536_v32 }
 0x43f   :  { %871 = vmatmul.mubr.f32.gmra.mxu0 %v3914_v21  ;;  %2992 = vmatprep.subr.mxu0 %v3327_v3 }
 0x440   :  { %2993 = vmatpush3.msra.mxu0 %v3545_v33  ;;  %3016 = vmatprep.mubr.msk.f32.mxu0 %vm3328_vm1, %v3327_v3 }
 0x441   :  { %2994 = vmatprep.subr.mxu0 %v3327_v3 }
 0x442   :  { %2995 = vmatpush3.msra.mxu0 %v3554_v34 }
 0x443   :  { %2996 = vmatprep.subr.mxu0 %v3327_v3 }
 0x444   :  { %2997 = vmatpush3.msra.mxu0 %v3563_v35 }
 0x445   :  { %2998 = vmatprep.subr.mxu0 %v3327_v3 }
 0x446   :  { %2999 = vmatpush3.msra.mxu0 %v3572_v36 }
 0x447   :  { %3000 = vmatprep.subr.mxu0 %v3327_v3 }
 0x448   :  { %3001 = vmatpush3.msra.mxu0 %v3581_v37 }
 0x449   :  { %3002 = vmatprep.subr.mxu0 %v3327_v3 }
 0x44a   :  { %3003 = vmatpush3.msra.mxu0 %v3590_v38 }
 0x44b   :  { %3004 = vmatprep.subr.mxu0 %v3327_v3 }
 0x44c   :  { %3005 = vmatpush3.msra.mxu0 %v3599_v39 }
 0x44d   :  { %3006 = vmatprep.subr.mxu0 %v3327_v3 }
 0x44e   :  { %3007 = vmatpush3.msra.mxu0 %v3608_v40 }
 0x44f   :  { %3008 = vmatprep.subr.mxu0 %v3327_v3 }
 0x450   :  { %3009 = vmatpush3.msra.mxu0 %v3617_v41 }
 0x451   :  { %3010 = vmatprep.subr.mxu0 %v3327_v3 }
 0x452   :  { %3011 = vmatpush3.msra.mxu0 %v3626_v42 }
 0x453   :  { %3012 = vmatprep.subr.mxu0 %v3327_v3 }
 0x454   :  { %3013 = vmatpush3.msra.mxu0 %v3635_v43 }
 0x455   :  { %3014 = vmatprep.subr.mxu0 %v3327_v3 }
 0x456   :  { %3015 = vmatpush3.msra.mxu0 %v3642_v44 }
 0x457   :  { %3059 = vmatprep.subr.mxu0 %v3327_v3 }
 0x4f3   :  { %v854_v22 = vpop.f32.mrf.mxu0 }
 0x4f4   :  { %v2980_v23 = vpop.f32.mrf.mxu1  ;;  %v962_v5 = vrot.slane %v854_v22, 7  ;;  %v970_v7 = vrot.slane %v854_v22, 1 }
 0x4f5   :  { %v856_v24 = vpop.f32.mrf.mxu0  ;;  %v979_v1 = vrot.slane %v2980_v23, 1  ;;  %v987_v8 = vrot.slane %v2980_v23, 7 }
 0x4f6   :  { %v943_v54 = vpop.f32.mrf.mxu1 }
 0x4f7   :  { %v860_v55 = vpop.f32.mrf.mxu0  ;;  %v986_v61 = vrot.slane %v943_v54, 7  ;;  %v978_v9 = vrot.slane %v943_v54, 1 }
 0x4f8   :  { %v2983_v57 = vpop.f32.mrf.mxu1  ;;  %v963_v62 = vrot.slane %v860_v55, 7  ;;  %v971_v63 = vrot.slane %v860_v55, 1 }
 0x4f9   :  { %v862_v58 = vpop.f32.mrf.mxu0  ;;  %v992_v18 = vsel %vm288_vm2, %v986_v61, %v987_v8  ;;  %v981_v20 = vrot.slane %v2983_v57, 1  ;;  %v989_v54 = vrot.slane %v2983_v57, 7  ;;  %v984_v61 = vsel %vm297_vm3, %v978_v9, %v979_v1 }
 0x4fa   :  { %v953_v59 = vpop.f32.mrf.mxu1  ;;  %v976_v19 = vsel %vm297_vm3, %v970_v7, %v971_v63  ;;  %v968_v25 = vsel %vm288_vm2, %v962_v5, %v963_v62 }
 0x4fb   :  { %v866_v60 = vpop.f32.mrf.mxu0  ;;  %v980_v49 = vrot.slane %v953_v59, 1  ;;  %v988_v26 = vrot.slane %v953_v59, 7  ;;  %v999_v55 = vadd.f32 %v968_v25, %v862_v58 }
 0x4fc   :  { %v964_v2 = vrot.slane %v866_v60, 7  ;;  %v972_v4 = vrot.slane %v866_v60, 1 }
 0x4fd   :  { %v868_v0 = vpop.f32.mrf.mxu0  ;;  %v983_v12 = vsel %vm297_vm3, %v979_v1, %v980_v49  ;;  %v990_v63 = vsel %vm288_vm2, %v988_v26, %v989_v54  ;;  %v982_v8 = vsel %vm297_vm3, %v980_v49, %v981_v20 }
 0x4fe   :  { %v967_v27 = vsel %vm288_vm2, %v963_v62, %v964_v2  ;;  %v1003_v47 = vsel %vm3662_vm4, %v992_v18, %v983_v12 }
 0x4ff   :  { %v872_v11 = vpop.f32.mrf.mxu0  ;;  %v1007_v62 = vadd.f32 %v1003_v47, %v999_v55  ;;  %v1403_v47 = vld [vmem:[%s4717_s3 + $0x178] sm:$0xff] }
 0x500   :  { %v965_v14 = vrot.slane %v872_v11, 7  ;;  %v973_v15 = vrot.slane %v872_v11, 1  ;;  %v985_v11 = vsel %vm297_vm3, %v981_v20, %v978_v9  ;;  %v1399_v55 = vld [vmem:[%s4717_s3 + $0x158] sm:$0xff] }
 0x501   :  { %v874_v22 = vpop.f32.mrf.mxu0 }
 0x502   :  { %v969_v28 = vsel %vm288_vm2, %v965_v14, %v962_v5  ;;  %v974_v45 = vsel %vm297_vm3, %v972_v4, %v973_v15  ;;  %v966_v23 = vsel %vm288_vm2, %v964_v2, %v965_v14 }
 0x503   :  { %v994_v48 = vsel %vm3668_vm5, %v976_v19, %v969_v28  ;;  %v996_v52 = vsel %vm3674_vm6, %v974_v45, %v967_v27  ;;  %v1001_v5 = vadd.f32 %v966_v23, %v874_v22  ;;  %v1402_v45 = vld [vmem:[%s4717_s3 + $0x170] sm:$0xff]  ;;  %v1401_v23 = vld [vmem:[%s4717_s3 + $0x168] sm:$0xff] }
 0x504   :  { %v998_v59 = vadd.f32 %v994_v48, %v856_v24  ;;  %v1000_v60 = vadd.f32 %v996_v52, %v868_v0  ;;  %v1005_v24 = vsel %vm3700_vm7, %v990_v63, %v985_v11  ;;  %v1400_v48 = vld [vmem:[%s4717_s3 + $0x160] sm:$0xff]  ;;  %v1393_v63 = vld [vmem:[%s4717_s3 + $0x128] sm:$0xff] }
 0x505   :  { %v1009_v58 = vadd.f32 %v1005_v24, %v1001_v5  ;;  %v1392_v5 = vld [vmem:[%s4717_s3 + $0x120] sm:$0xff]  ;;  %v1389_v11 = vld [vmem:[%s4717_s3 + $0x108] sm:$0xff]  ;;  %v1386_v24 = vld [vmem:[%s4717_s3 + $0xf0] sm:$0xff] }
 0x506   :  { %v1006_v7 = vadd.f32 %v998_v59, %v984_v61  ;;  %v1008_v2 = vadd.f32 %v1000_v60, %v982_v8  ;;  %v1398_v59 = vld [vmem:[%s4717_s3 + $0x150] sm:$0xff]  ;;  %v1396_v60 = vld [vmem:[%s4717_s3 + $0x140] sm:$0xff]  ;;  %v1395_v61 = vld [vmem:[%s4717_s3 + $0x138] sm:$0xff] }
 0x507   :  { %v1390_v8 = vld [vmem:[%s4717_s3 + $0x110] sm:$0xff] }
 0x508   :  { %v1010_v57 = vadd.f32 %v1007_v62, %v1006_v7 }
 0x50a   :  { %v1011_v0 = vadd.f32 %v1010_v57, %v1008_v2  ;;  %v1387_v57 = vld [vmem:[%s4717_s3 + $0xf8] sm:$0xff] }
 0x50c   :  { %v1012_v1 = vadd.f32 %v1011_v0, %v1009_v58  ;;  %v1384_v0 = vld [vmem:[%s4717_s3 + $0xe0] sm:$0xff] }
 0x50e   :  { %v1013_v12 = vrot.slane %v1012_v1, 4 }
 0x510   :  { %v1014_v4 = vadd.f32 %v1013_v12, %v1012_v1  ;;  %v1383_v1 = vld [vmem:[%s4717_s3 + $0xd8] sm:$0xff]  ;;  %v1385_v12 = vld [vmem:[%s4717_s3 + $0xe8] sm:$0xff] }
 0x512   :  { %v1015_v14 = vrot.slane %v1014_v4, 2 }
 0x514   :  { %v1016_v15 = vadd.f32 %v1015_v14, %v1014_v4  ;;  %v1381_v4 = vld [vmem:[%s4717_s3 + $0xc8] sm:$0xff]  ;;  %v1380_v14 = vld [vmem:[%s4717_s3 + $0xc0] sm:$0xff] }
 0x516   :  { %v1017_v18 = vrot.slane %v1016_v15, 1 }
 0x518   :  { %v1018_v19 = vadd.f32 %v1017_v18, %v1016_v15  ;;  %v1382_v15 = vld [vmem:[%s4717_s3 + $0xd0] sm:$0xff] }
 0x519   :  { %v1378_v18 = vld [vmem:[%s4717_s3 + $0xb0] sm:$0xff] }
 0x51a   :  { %3017 = vmatmul.mubr.f32.vlgmr.msra.gmra.mxu0 %v1018_v19  ;;  %v1377_v19 = vld [vmem:[%s4717_s3 + $0xa8] sm:$0xff] }
 0x51b   :  { %3060 = vmatpush3.msra.mxu0 %v3713_v13  ;;  %3061 = vmatprep.mubr.msk.f32.mxu0 %vm3328_vm1, %v3327_v3 }
 0x51c   :  { %1404 = vmatprep.subr.mxu0 %v1402_v45  ;;  %v1357_v45 = vld [vmem:[%s4717_s3 + $0x8] sm:$0xff] }
 0x5da   :  { %v1085_v49 = vpop.f32.mrf.mxu0 }
 0x5db   :  { %v1089_v9 = vmul.f32 0.001953125, %v1085_v49  ;;  %v1379_v49 = vld [vmem:[%s4717_s3 + $0xb8] sm:$0xff] }
 0x5dc   :  { %v3018_v20 = vpop.f32.mrf.mxu0 }
 0x5dd   :  { %3022 = vmatmul.mubr.msk.f32.vlgmr.msra.gmra.mxu1 %vm473_vm8, %v1089_v9  ;;  %v1375_v9 = vld [vmem:[%s4717_s3 + $0x98] sm:$0xff]  ;;  %v1374_v20 = vld [vmem:[%s4717_s3 + $0x90] sm:$0xff] }
 0x5de   :  { %3025 = vmatpush3.msra.mxu1 %v3510_v29  ;;  %3056 = vmatprep.mubr.msk.f32.mxu1 %vm3328_vm1, %v3327_v3 }
 0x5df   :  { %3026 = vmatprep.subr.mxu1 %v3327_v3 }
 0x5e0   :  { %3027 = vmatpush3.msra.mxu1 %v3518_v30 }
 0x5e1   :  { %3028 = vmatprep.subr.mxu1 %v3327_v3 }
 0x5e2   :  { %3029 = vmatpush3.msra.mxu1 %v3527_v31 }
 0x5e3   :  { %3030 = vmatprep.subr.mxu1 %v3327_v3 }
 0x5e4   :  { %3031 = vmatpush3.msra.mxu1 %v3536_v32 }
 0x5e5   :  { %3032 = vmatprep.subr.mxu1 %v3327_v3 }
 0x5e6   :  { %3033 = vmatpush3.msra.mxu1 %v3545_v33 }
 0x5e7   :  { %3034 = vmatprep.subr.mxu1 %v3327_v3 }
 0x5e8   :  { %3035 = vmatpush3.msra.mxu1 %v3554_v34 }
 0x5e9   :  { %3036 = vmatprep.subr.mxu1 %v3327_v3 }
 0x5ea   :  { %3037 = vmatpush3.msra.mxu1 %v3563_v35 }
 0x5eb   :  { %3038 = vmatprep.subr.mxu1 %v3327_v3 }
 0x5ec   :  { %3039 = vmatpush3.msra.mxu1 %v3572_v36 }
 0x5ed   :  { %3040 = vmatprep.subr.mxu1 %v3327_v3 }
 0x5ee   :  { %3041 = vmatpush3.msra.mxu1 %v3581_v37 }
 0x5ef   :  { %3042 = vmatprep.subr.mxu1 %v3327_v3 }
 0x5f0   :  { %3043 = vmatpush3.msra.mxu1 %v3590_v38 }
 0x5f1   :  { %3044 = vmatprep.subr.mxu1 %v3327_v3 }
 0x5f2   :  { %3045 = vmatpush3.msra.mxu1 %v3599_v39 }
 0x5f3   :  { %3046 = vmatprep.subr.mxu1 %v3327_v3 }
 0x5f4   :  { %3047 = vmatpush3.msra.mxu1 %v3608_v40 }
 0x5f5   :  { %3048 = vmatprep.subr.mxu1 %v3327_v3 }
 0x5f6   :  { %3049 = vmatpush3.msra.mxu1 %v3617_v41 }
 0x5f7   :  { %3050 = vmatprep.subr.mxu1 %v3327_v3 }
 0x5f8   :  { %3051 = vmatpush3.msra.mxu1 %v3626_v42 }
 0x5f9   :  { %3052 = vmatprep.subr.mxu1 %v3327_v3 }
 0x5fa   :  { %3053 = vmatpush3.msra.mxu1 %v3635_v43 }
 0x5fb   :  { %3054 = vmatprep.subr.mxu1 %v3327_v3 }
 0x5fc   :  { %3055 = vmatpush3.msra.mxu1 %v3642_v44 }
 0x5fd   :  { %3064 = vmatprep.subr.mxu1 %v1403_v47 }
 0x69d   :  { %v1159_v29 = vpop.f32.mrf.mxu1 }
 0x69e   :  { %v1166_v30 = vrot.slane %v1159_v29, %v3724_v17  ;;  %v1376_v29 = vld [vmem:[%s4717_s3 + $0xa0] sm:$0xff] }
 0x69f   :  { %v3023_v31 = vpop.f32.mrf.mxu1 }
 0x6a0   :  { %v4029_v32 = vsub.f32 %v1006_v7, %v1166_v30  ;;  %v4031_v33 = vsub.f32 %v1007_v62, %v1166_v30  ;;  %v4033_v34 = vsub.f32 %v1008_v2, %v1166_v30  ;;  %v4035_v35 = vsub.f32 %v1009_v58, %v1166_v30  ;;  %v1397_v62 = vld [vmem:[%s4717_s3 + $0x148] sm:$0xff]  ;;  %v1394_v7 = vld [vmem:[%s4717_s3 + $0x130] sm:$0xff]  ;;  %v1391_v2 = vld [vmem:[%s4717_s3 + $0x118] sm:$0xff] }
 0x6a1   :  { %v1388_v58 = vld [vmem:[%s4717_s3 + $0x100] sm:$0xff]  ;;  %v1371_v31 = vld [vmem:[%s4717_s3 + $0x78] sm:$0xff] }
 0x6a2   :  { %v1171_v36 = vmul.f32 %v4029_v32, %v4029_v32  ;;  %v1172_v37 = vmul.f32 %v4031_v33, %v4031_v33  ;;  %v1173_v38 = vmul.f32 %v4033_v34, %v4033_v34  ;;  %v1174_v40 = vmul.f32 %v4035_v35, %v4035_v35  ;;  %v1372_v30 = vld [vmem:[%s4717_s3 + $0x80] sm:$0xff] }
 0x6a4   :  { %v1175_v39 = vadd.f32 %v1172_v37, %v1171_v36  ;;  %v1373_v36 = vld [vmem:[%s4717_s3 + $0x88] sm:$0xff] }
 0x6a5   :  { %v1369_v37 = vld [vmem:[%s4717_s3 + $0x68] sm:$0xff] }
 0x6a6   :  { %v1176_v41 = vadd.f32 %v1175_v39, %v1173_v38  ;;  %v1368_v38 = vld [vmem:[%s4717_s3 + $0x60] sm:$0xff]  ;;  %v1370_v39 = vld [vmem:[%s4717_s3 + $0x70] sm:$0xff] }
 0x6a8   :  { %v1177_v42 = vadd.f32 %v1176_v41, %v1174_v40  ;;  %v1366_v40 = vld [vmem:[%s4717_s3 + $0x50] sm:$0xff]  ;;  %v1365_v41 = vld [vmem:[%s4717_s3 + $0x48] sm:$0xff] }
 0x6aa   :  { %v1178_v43 = vrot.slane %v1177_v42, 4 }
 0x6ac   :  { %v1179_v44 = vadd.f32 %v1178_v43, %v1177_v42  ;;  %v1367_v42 = vld [vmem:[%s4717_s3 + $0x58] sm:$0xff] }
 0x6ad   :  { %v1363_v43 = vld [vmem:[%s4717_s3 + $0x38] sm:$0xff] }
 0x6ae   :  { %v1180_v25 = vrot.slane %v1179_v44, 2 }
 0x6b0   :  { %v1181_v26 = vadd.f32 %v1180_v25, %v1179_v44  ;;  %v1362_v44 = vld [vmem:[%s4717_s3 + $0x30] sm:$0xff]  ;;  %v1364_v25 = vld [vmem:[%s4717_s3 + $0x40] sm:$0xff] }
 0x6b2   :  { %v1182_v27 = vrot.slane %v1181_v26, 1 }
 0x6b4   :  { %v1183_v28 = vadd.f32 %v1182_v27, %v1181_v26  ;;  %v1360_v26 = vld [vmem:[%s4717_s3 + $0x20] sm:$0xff]  ;;  %v1359_v27 = vld [vmem:[%s4717_s3 + $0x18] sm:$0xff] }
 0x6b6   :  { %3057 = vmatmul.mubr.f32.vlgmr.msra.gmra.mxu1 %v1183_v28  ;;  %v1361_v28 = vld [vmem:[%s4717_s3 + $0x28] sm:$0xff] }
 0x6b7   :  { %3065 = vmatpush3.msra.mxu1 %v1403_v47  ;;  %v1356_v47 = vld [vmem:[%s4717_s3] sm:$0xff] }
 0x6b8   :  { %3066 = vmatprep.subr.mxu1 %v1400_v48 }
 0x6b9   :  { %3067 = vmatpush3.msra.mxu1 %v1400_v48  ;;  %v1358_v48 = vld [vmem:[%s4717_s3 + $0x10] sm:$0xff] }
 0x6ba   :  { %3068 = vmatprep.subr.mxu1 %v1397_v62 }
 0x6bb   :  { %3069 = vmatpush3.msra.mxu1 %v1397_v62 }
 0x6bc   :  { %3070 = vmatprep.subr.mxu1 %v1394_v7 }
 0x6bd   :  { %3071 = vmatpush3.msra.mxu1 %v1394_v7 }
 0x6be   :  { %3072 = vmatprep.subr.mxu1 %v1391_v2 }
 0x6bf   :  { %3073 = vmatpush3.msra.mxu1 %v1391_v2 }
 0x6c0   :  { %3074 = vmatprep.subr.mxu1 %v1388_v58 }
 0x6c1   :  { %3075 = vmatpush3.msra.mxu1 %v1388_v58 }
 0x6c2   :  { %3076 = vmatprep.subr.mxu1 %v1385_v12 }
 0x6c3   :  { %3077 = vmatpush3.msra.mxu1 %v1385_v12  ;;  %v4251_v12 = vld [vmem:[%s4712_s5 + $0x50] sm:$0xff] }
 0x6c4   :  { %3078 = vmatprep.subr.mxu1 %v1382_v15 }
 0x6c5   :  { %3079 = vmatpush3.msra.mxu1 %v1382_v15  ;;  %v4272_v15 = vld [vmem:[%s4712_s5 + $0x38] sm:$0xff] }
 0x6c6   :  { %3080 = vmatprep.subr.mxu1 %v1379_v49 }
 0x6c7   :  { %3081 = vmatpush3.msra.mxu1 %v1379_v49  ;;  %v4293_v49 = vld [vmem:[%s4712_s5 + $0x20] sm:$0xff] }
 0x6c8   :  { %3082 = vmatprep.subr.mxu1 %v1376_v29 }
 0x6c9   :  { %3083 = vmatpush3.msra.mxu1 %v1376_v29  ;;  %v4314_v29 = vld [vmem:[%s4712_s5 + $0x8] sm:$0xff] }
 0x6ca   :  { %3084 = vmatprep.subr.mxu1 %v1373_v36 }
 0x6cb   :  { %3085 = vmatpush3.msra.mxu1 %v1373_v36 }
 0x6cc   :  { %3086 = vmatprep.subr.mxu1 %v1370_v39 }
 0x6cd   :  { %3087 = vmatpush3.msra.mxu1 %v1370_v39 }
 0x6ce   :  { %3088 = vmatprep.subr.mxu1 %v1367_v42 }
 0x6cf   :  { %3089 = vmatpush3.msra.mxu1 %v1367_v42 }
 0x6d0   :  { %3090 = vmatprep.subr.mxu1 %v1364_v25 }
 0x6d1   :  { %3091 = vmatpush3.msra.mxu1 %v1364_v25 }
 0x6d2   :  { %3092 = vmatprep.subr.mxu1 %v1361_v28 }
 0x6d3   :  { %3093 = vmatpush3.msra.mxu1 %v1361_v28 }
 0x6d4   :  { %3094 = vmatprep.subr.mxu1 %v1358_v48 }
 0x6d5   :  { %3095 = vmatpush3.msra.mxu1 %v1358_v48 }
 0x6d6   :  { %3137 = vmatprep.subr.mxu1 %v3327_v3 }
 0x776   :  { %v1250_v52 = vpop.f32.mrf.mxu1 }
 0x777   :  { %v1254_v22 = vmul.f32 0.001953125, %v1250_v52 }
 0x778   :  { %v3058_v54 = vpop.f32.mrf.mxu1 }
 0x779   :  { %3062 = vmatmul.mubr.msk.f32.vlgmr.msra.gmra.mxu0 %vm473_vm8, %v1254_v22  ;;  %v1255_v54 = vld [vmem:[%s4718_s9] sm:$0x1] }
 0x77a   :  { %1405 = vmatpush1.msra.mxu0 %v1401_v23  ;;  %1468 = vmatprep.mubr.f32.mxu0 %v3327_v3 }
 0x77b   :  { %1406 = vmatprep.subr.mxu0 %v1399_v55 }
 0x77c   :  { %1407 = vmatpush1.msra.mxu0 %v1398_v59 }
 0x77d   :  { %1408 = vmatprep.subr.mxu0 %v1396_v60 }
 0x77e   :  { %1409 = vmatpush1.msra.mxu0 %v1395_v61  ;;  %v2613_v61 = vld [vmem:[%s4719_s10] ss:$0 sm:$0xff] }
 0x77f   :  { %1410 = vmatprep.subr.mxu0 %v1393_v63 }
 0x780   :  { %1411 = vmatpush1.msra.mxu0 %v1392_v5 }
 0x781   :  { %1412 = vmatprep.subr.mxu0 %v1390_v8 }
 0x782   :  { %1413 = vmatpush1.msra.mxu0 %v1389_v11 }
 0x783   :  { %1414 = vmatprep.subr.mxu0 %v1387_v57 }
 0x784   :  { %1415 = vmatpush1.msra.mxu0 %v1386_v24 }
 0x785   :  { %1416 = vmatprep.subr.mxu0 %v1384_v0 }
 0x786   :  { %1417 = vmatpush1.msra.mxu0 %v1383_v1  ;;  %v4242_v1 = vld [vmem:[%s4712_s5 + $0x58] sm:$0xff] }
 0x787   :  { %1418 = vmatprep.subr.mxu0 %v1381_v4  ;;  %v4258_v4 = vld [vmem:[%s4712_s5 + $0x48] sm:$0xff] }
 0x788   :  { %1419 = vmatpush1.msra.mxu0 %v1380_v14  ;;  %v4265_v14 = vld [vmem:[%s4712_s5 + $0x40] sm:$0xff] }
 0x789   :  { %1420 = vmatprep.subr.mxu0 %v1378_v18  ;;  %v4279_v18 = vld [vmem:[%s4712_s5 + $0x30] sm:$0xff] }
 0x78a   :  { %1421 = vmatpush1.msra.mxu0 %v1377_v19  ;;  %v4286_v19 = vld [vmem:[%s4712_s5 + $0x28] sm:$0xff] }
 0x78b   :  { %1422 = vmatprep.subr.mxu0 %v1375_v9  ;;  %v4300_v9 = vld [vmem:[%s4712_s5 + $0x18] sm:$0xff] }
 0x78c   :  { %1423 = vmatpush1.msra.mxu0 %v1374_v20  ;;  %v4307_v20 = vld [vmem:[%s4712_s5 + $0x10] sm:$0xff] }
 0x78d   :  { %1424 = vmatprep.subr.mxu0 %v1372_v30  ;;  %v4321_v30 = vld [vmem:[%s4712_s5] sm:$0xff] }
 0x78e   :  { %1425 = vmatpush1.msra.mxu0 %v1371_v31 }
 0x78f   :  { %1426 = vmatprep.subr.mxu0 %v1369_v37 }
 0x790   :  { %1427 = vmatpush1.msra.mxu0 %v1368_v38 }
 0x791   :  { %1428 = vmatprep.subr.mxu0 %v1366_v40 }
 0x792   :  { %1429 = vmatpush1.msra.mxu0 %v1365_v41 }
 0x793   :  { %1430 = vmatprep.subr.mxu0 %v1363_v43 }
 0x794   :  { %1431 = vmatpush1.msra.mxu0 %v1362_v44 }
 0x795   :  { %1432 = vmatprep.subr.mxu0 %v1360_v26 }
 0x796   :  { %1433 = vmatpush1.msra.mxu0 %v1359_v27 }
 0x797   :  { %1434 = vmatprep.subr.mxu0 %v1357_v45 }
 0x798   :  { %1435 = vmatpush1.msra.mxu0 %v1356_v47 }
 0x799   :  { %3102 = vmatprep.subr.mxu0 %v3327_v3 }
 0x839   :  { %v1325_v52 = vpop.f32.mrf.mxu0 }
 0x83a   :  { %v1326_v22 = vadd.f32 1e-05, %v1325_v52 }
 0x83b   :  { %v3063_v23 = vpop.f32.mrf.mxu0 }
 0x83c   :  { %3304 = vrsqrt.f32 %v1326_v22 }
 0x849   :  { %v3305_v55 = vpop.eup %3304 }
 0x84a   :  { %v1330_v59 = vmul.f32 %v3305_v55, %v1255_v54 }
 0x84c   :  { %v1335_v60 = vrot.slane %v1330_v59, %v3724_v17 }
 0x84e   :  { %v1337_v62 = vmul.f32 %v1335_v60, %v4029_v32  ;;  %v1338_v63 = vmul.f32 %v1335_v60, %v4031_v33  ;;  %v1339_v5 = vmul.f32 %v1335_v60, %v4033_v34  ;;  %v1340_v7 = vmul.f32 %v1335_v60, %v4035_v35  ;;  %v4208_v32 = vld [vmem:[%s4712_s5 + $0x78] sm:$0xff]  ;;  %v4218_v34 = vld [vmem:[%s4712_s5 + $0x70] sm:$0xff]  ;;  %v4235_v35 = vld [vmem:[%s4712_s5 + $0x60] sm:$0xff] }
 0x850   :  { %v1348_v8 = vadd.f32 %v2613_v61, %v1337_v62  ;;  %v1349_v11 = vadd.f32 %v2613_v61, %v1338_v63  ;;  %v1350_v2 = vadd.f32 %v2613_v61, %v1339_v5  ;;  %v1351_v58 = vadd.f32 %v2613_v61, %v1340_v7 }
 0x852   :  { %v1352_v57 = vmax.f32 %v1348_v8, 0.0  ;;  %v1353_v24 = vmax.f32 %v1349_v11, 0.0  ;;  %v1354_v0 = vmax.f32 %v1350_v2, 0.0  ;;  %v1355_v33 = vmax.f32 %v1351_v58, 0.0 }
 0x854   :  { %1469 = vmatmul.mubr.f32.vlgmr.msra.gmra.mxu0 %v1352_v57  ;;  %3096 = vmatprep.mubr.f32.mxu1 %v1352_v57 }
 0x855   :  { %3097 = vmatmul.mubr.f32.vlgmr.msra.gmra.mxu1 %v1353_v24  ;;  %1474 = vmatprep.mubr.f32.mxu0 %v3327_v3 }
 0x856   :  { %3099 = vmatprep.mubr.f32.mxu1 %v1354_v0  ;;  %3103 = vmatpush3.msra.mxu0 %v4208_v32 }
 0x857   :  { %3104 = vmatprep.subr.mxu0 %v3327_v3  ;;  %3138 = vmatpush3.msra.mxu1 %v3713_v13  ;;  %v4228_v13 = vld [vmem:[%s4712_s5 + $0x68] sm:$0xff] }
 0x858   :  { %1475 = vmatmul.mubr.f32.gmra.mxu0 %v1353_v24  ;;  %3142 = vmatprep.subr.mxu1 %v3327_v3 }
 0x859   :  { %3100 = vmatmul.mubr.f32.gmra.mxu1 %v1355_v33  ;;  %1480 = vmatprep.mubr.f32.mxu0 %v3327_v3 }
 0x85a   :  { %3105 = vmatpush3.msra.mxu0 %v4218_v34  ;;  %3139 = vmatprep.mubr.msk.f32.mxu1 %vm3328_vm1, %v3327_v3 }
 0x85b   :  { %3106 = vmatprep.subr.mxu0 %v3327_v3 }
 0x85c   :  { %1481 = vmatmul.mubr.f32.gmra.mxu0 %v1354_v0 }
 0x85d   :  { %1486 = vmatprep.mubr.f32.mxu0 %v3327_v3  ;;  %3107 = vmatpush3.msra.mxu0 %v4228_v13 }
 0x85e   :  { %3108 = vmatprep.subr.mxu0 %v3327_v3 }
 0x85f   :  { %3109 = vmatpush3.msra.mxu0 %v4235_v35 }
 0x860   :  { %1487 = vmatmul.mubr.f32.gmra.mxu0 %v1355_v33  ;;  %3110 = vmatprep.subr.mxu0 %v3327_v3 }
 0x861   :  { %3111 = vmatpush3.msra.mxu0 %v4242_v1  ;;  %3134 = vmatprep.mubr.msk.f32.mxu0 %vm3328_vm1, %v3327_v3 }
 0x862   :  { %3112 = vmatprep.subr.mxu0 %v3327_v3 }
 0x863   :  { %3113 = vmatpush3.msra.mxu0 %v4251_v12 }
 0x864   :  { %3114 = vmatprep.subr.mxu0 %v3327_v3 }
 0x865   :  { %3115 = vmatpush3.msra.mxu0 %v4258_v4 }
 0x866   :  { %3116 = vmatprep.subr.mxu0 %v3327_v3 }
 0x867   :  { %3117 = vmatpush3.msra.mxu0 %v4265_v14 }
 0x868   :  { %3118 = vmatprep.subr.mxu0 %v3327_v3 }
 0x869   :  { %3119 = vmatpush3.msra.mxu0 %v4272_v15 }
 0x86a   :  { %3120 = vmatprep.subr.mxu0 %v3327_v3 }
 0x86b   :  { %3121 = vmatpush3.msra.mxu0 %v4279_v18 }
 0x86c   :  { %3122 = vmatprep.subr.mxu0 %v3327_v3 }
 0x86d   :  { %3123 = vmatpush3.msra.mxu0 %v4286_v19 }
 0x86e   :  { %3124 = vmatprep.subr.mxu0 %v3327_v3 }
 0x86f   :  { %3125 = vmatpush3.msra.mxu0 %v4293_v49 }
 0x870   :  { %3126 = vmatprep.subr.mxu0 %v3327_v3 }
 0x871   :  { %3127 = vmatpush3.msra.mxu0 %v4300_v9 }
 0x872   :  { %3128 = vmatprep.subr.mxu0 %v3327_v3 }
 0x873   :  { %3129 = vmatpush3.msra.mxu0 %v4307_v20 }
 0x874   :  { %3130 = vmatprep.subr.mxu0 %v3327_v3 }
 0x875   :  { %3131 = vmatpush3.msra.mxu0 %v4314_v29 }
 0x876   :  { %3132 = vmatprep.subr.mxu0 %v3327_v3 }
 0x877   :  { %3133 = vmatpush3.msra.mxu0 %v4321_v30 }
 0x878   :  { %3177 = vmatprep.subr.mxu0 %v3327_v3 }
 0x914   :  { %v1470_v31 = vpop.f32.mrf.mxu0 }
 0x915   :  { %v3098_v36 = vpop.f32.mrf.mxu1  ;;  %v1578_v48 = vrot.slane %v1470_v31, 7  ;;  %v1586_v52 = vrot.slane %v1470_v31, 1 }
 0x916   :  { %v1472_v37 = vpop.f32.mrf.mxu0  ;;  %v1595_v45 = vrot.slane %v3098_v36, 1  ;;  %v1603_v22 = vrot.slane %v3098_v36, 7 }
 0x917   :  { %v1559_v38 = vpop.f32.mrf.mxu1 }
 0x918   :  { %v1476_v39 = vpop.f32.mrf.mxu0  ;;  %v1602_v25 = vrot.slane %v1559_v38, 7  ;;  %v1594_v23 = vrot.slane %v1559_v38, 1 }
 0x919   :  { %v3101_v40 = vpop.f32.mrf.mxu1  ;;  %v1579_v26 = vrot.slane %v1476_v39, 7  ;;  %v1587_v27 = vrot.slane %v1476_v39, 1 }
 0x91a   :  { %v1478_v41 = vpop.f32.mrf.mxu0  ;;  %v1608_v62 = vsel %vm288_vm2, %v1602_v25, %v1603_v22  ;;  %v1597_v5 = vrot.slane %v3101_v40, 1  ;;  %v1605_v36 = vrot.slane %v3101_v40, 7 }
 0x91b   :  { %v1569_v42 = vpop.f32.mrf.mxu1  ;;  %v1592_v63 = vsel %vm297_vm3, %v1586_v52, %v1587_v27  ;;  %v1584_v7 = vsel %vm288_vm2, %v1578_v48, %v1579_v26 }
 0x91c   :  { %v1482_v43 = vpop.f32.mrf.mxu0  ;;  %v1596_v44 = vrot.slane %v1569_v42, 1  ;;  %v1604_v8 = vrot.slane %v1569_v42, 7  ;;  %v1615_v38 = vadd.f32 %v1584_v7, %v1478_v41  ;;  %v1601_v22 = vsel %vm297_vm3, %v1597_v5, %v1594_v23 }
 0x91d   :  { %v1580_v47 = vrot.slane %v1482_v43, 7  ;;  %v1588_v59 = vrot.slane %v1482_v43, 1  ;;  %v1600_v43 = vsel %vm297_vm3, %v1594_v23, %v1595_v45 }
 0x91e   :  { %v1484_v28 = vpop.f32.mrf.mxu0  ;;  %v1599_v55 = vsel %vm297_vm3, %v1595_v45, %v1596_v44  ;;  %v1598_v52 = vsel %vm297_vm3, %v1596_v44, %v1597_v5  ;;  %v4360_v44 = vld [vmem:[%s4713_s6] sm:$0xff] }
 0x91f   :  { %v1583_v11 = vsel %vm288_vm2, %v1579_v26, %v1580_v47  ;;  %v1619_v24 = vsel %vm3662_vm4, %v1608_v62, %v1599_v55  ;;  %v1606_v26 = vsel %vm288_vm2, %v1604_v8, %v1605_v36 }
 0x920   :  { %v1488_v54 = vpop.f32.mrf.mxu0  ;;  %v1623_v25 = vadd.f32 %v1619_v24, %v1615_v38 }
 0x921   :  { %v1581_v60 = vrot.slane %v1488_v54, 7  ;;  %v1589_v61 = vrot.slane %v1488_v54, 1 }
 0x922   :  { %v1490_v33 = vpop.f32.mrf.mxu0 }
 0x923   :  { %v1585_v2 = vsel %vm288_vm2, %v1581_v60, %v1578_v48  ;;  %v1590_v57 = vsel %vm297_vm3, %v1588_v59, %v1589_v61  ;;  %v1582_v31 = vsel %vm288_vm2, %v1580_v47, %v1581_v60 }
 0x924   :  { %v1610_v58 = vsel %vm3668_vm5, %v1592_v63, %v1585_v2  ;;  %v1612_v0 = vsel %vm3674_vm6, %v1590_v57, %v1583_v11  ;;  %v1617_v27 = vadd.f32 %v1582_v31, %v1490_v33 }
 0x925   :  { %v1614_v39 = vadd.f32 %v1610_v58, %v1472_v37  ;;  %v1616_v42 = vadd.f32 %v1612_v0, %v1484_v28  ;;  %v1621_v37 = vsel %vm3700_vm7, %v1606_v26, %v1601_v22  ;;  %v2022_v22 = vld [vmem:[%s4720_s4 + $0x170] sm:$0xff] }
 0x926   :  { %v1625_v41 = vadd.f32 %v1621_v37, %v1617_v27 }
 0x927   :  { %v1622_v48 = vadd.f32 %v1614_v39, %v1600_v43  ;;  %v1624_v47 = vadd.f32 %v1616_v42, %v1598_v52 }
 0x929   :  { %v1626_v40 = vadd.f32 %v1623_v25, %v1622_v48 }
 0x92b   :  { %v1627_v28 = vadd.f32 %v1626_v40, %v1624_v47 }
 0x92d   :  { %v1628_v45 = vadd.f32 %v1627_v28, %v1625_v41 }
 0x92f   :  { %v1629_v54 = vrot.slane %v1628_v45, 4 }
 0x931   :  { %v1630_v55 = vadd.f32 %v1629_v54, %v1628_v45  ;;  %v2019_v45 = vld [vmem:[%s4720_s4 + $0x158] sm:$0xff]  ;;  %v2018_v54 = vld [vmem:[%s4720_s4 + $0x150] sm:$0xff] }
 0x933   :  { %v1631_v59 = vrot.slane %v1630_v55, 2 }
 0x935   :  { %v1632_v60 = vadd.f32 %v1631_v59, %v1630_v55  ;;  %v2020_v55 = vld [vmem:[%s4720_s4 + $0x160] sm:$0xff] }
 0x936   :  { %v2016_v59 = vld [vmem:[%s4720_s4 + $0x140] sm:$0xff] }
 0x937   :  { %v1633_v61 = vrot.slane %v1632_v60, 1 }
 0x939   :  { %v1634_v62 = vadd.f32 %v1633_v61, %v1632_v60  ;;  %v2015_v60 = vld [vmem:[%s4720_s4 + $0x138] sm:$0xff]  ;;  %v2017_v61 = vld [vmem:[%s4720_s4 + $0x148] sm:$0xff] }
 0x93b   :  { %3135 = vmatmul.mubr.f32.vlgmr.msra.gmra.mxu0 %v1634_v62  ;;  %v2013_v62 = vld [vmem:[%s4720_s4 + $0x128] sm:$0xff] }
 0x93c   :  { %3178 = vmatpush3.msra.mxu0 %v4360_v44  ;;  %3179 = vmatprep.mubr.msk.f32.mxu0 %vm3328_vm1, %v3327_v3 }
 0x93d   :  { %2024 = vmatprep.subr.mxu0 %v2022_v22  ;;  %v1996_v22 = vld [vmem:[%s4720_s4 + $0xa0] sm:$0xff] }
 0x9fb   :  { %v1701_v23 = vpop.f32.mrf.mxu0 }
 0x9fc   :  { %v1705_v63 = vmul.f32 0.001953125, %v1701_v23  ;;  %v2012_v23 = vld [vmem:[%s4720_s4 + $0x120] sm:$0xff] }
 0x9fd   :  { %v3136_v5 = vpop.f32.mrf.mxu0 }
 0x9fe   :  { %3140 = vmatmul.mubr.msk.f32.vlgmr.msra.gmra.mxu1 %vm473_vm8, %v1705_v63  ;;  %v2014_v63 = vld [vmem:[%s4720_s4 + $0x130] sm:$0xff] }
 0x9ff   :  { %3143 = vmatpush3.msra.mxu1 %v4208_v32  ;;  %3174 = vmatprep.mubr.msk.f32.mxu1 %vm3328_vm1, %v3327_v3  ;;  %v2010_v5 = vld [vmem:[%s4720_s4 + $0x110] sm:$0xff] }
 0xa00   :  { %3144 = vmatprep.subr.mxu1 %v3327_v3 }
 0xa01   :  { %3145 = vmatpush3.msra.mxu1 %v4218_v34 }
 0xa02   :  { %3146 = vmatprep.subr.mxu1 %v3327_v3 }
 0xa03   :  { %3147 = vmatpush3.msra.mxu1 %v4228_v13 }
 0xa04   :  { %3148 = vmatprep.subr.mxu1 %v3327_v3 }
 0xa05   :  { %3149 = vmatpush3.msra.mxu1 %v4235_v35 }
 0xa06   :  { %3150 = vmatprep.subr.mxu1 %v3327_v3 }
 0xa07   :  { %3151 = vmatpush3.msra.mxu1 %v4242_v1 }
 0xa08   :  { %3152 = vmatprep.subr.mxu1 %v3327_v3 }
 0xa09   :  { %3153 = vmatpush3.msra.mxu1 %v4251_v12 }
 0xa0a   :  { %3154 = vmatprep.subr.mxu1 %v3327_v3 }
 0xa0b   :  { %3155 = vmatpush3.msra.mxu1 %v4258_v4 }
 0xa0c   :  { %3156 = vmatprep.subr.mxu1 %v3327_v3 }
 0xa0d   :  { %3157 = vmatpush3.msra.mxu1 %v4265_v14 }
 0xa0e   :  { %3158 = vmatprep.subr.mxu1 %v3327_v3 }
 0xa0f   :  { %3159 = vmatpush3.msra.mxu1 %v4272_v15 }
 0xa10   :  { %3160 = vmatprep.subr.mxu1 %v3327_v3 }
 0xa11   :  { %3161 = vmatpush3.msra.mxu1 %v4279_v18 }
 0xa12   :  { %3162 = vmatprep.subr.mxu1 %v3327_v3 }
 0xa13   :  { %3163 = vmatpush3.msra.mxu1 %v4286_v19 }
 0xa14   :  { %3164 = vmatprep.subr.mxu1 %v3327_v3 }
 0xa15   :  { %3165 = vmatpush3.msra.mxu1 %v4293_v49 }
 0xa16   :  { %3166 = vmatprep.subr.mxu1 %v3327_v3 }
 0xa17   :  { %3167 = vmatpush3.msra.mxu1 %v4300_v9 }
 0xa18   :  { %3168 = vmatprep.subr.mxu1 %v3327_v3 }
 0xa19   :  { %3169 = vmatpush3.msra.mxu1 %v4307_v20 }
 0xa1a   :  { %3170 = vmatprep.subr.mxu1 %v3327_v3 }
 0xa1b   :  { %3171 = vmatpush3.msra.mxu1 %v4314_v29 }
 0xa1c   :  { %3172 = vmatprep.subr.mxu1 %v3327_v3 }
 0xa1d   :  { %3173 = vmatpush3.msra.mxu1 %v4321_v30 }
 0xabe   :  { %v1775_v7 = vpop.f32.mrf.mxu1 }
 0xabf   :  { %v1782_v8 = vrot.slane %v1775_v7, %v3724_v17  ;;  %v2009_v7 = vld [vmem:[%s4720_s4 + $0x108] sm:$0xff] }
 0xac0   :  { %v3141_v11 = vpop.f32.mrf.mxu1 }
 0xac1   :  { %v4400_v2 = vsub.f32 %v1622_v48, %v1782_v8  ;;  %v4402_v57 = vsub.f32 %v1623_v25, %v1782_v8  ;;  %v4404_v24 = vsub.f32 %v1624_v47, %v1782_v8  ;;  %v4406_v58 = vsub.f32 %v1625_v41, %v1782_v8  ;;  %v2023_v47 = vld [vmem:[%s4720_s4 + $0x178] sm:$0xff]  ;;  %v2021_v41 = vld [vmem:[%s4720_s4 + $0x168] sm:$0xff] }
 0xac2   :  { %3182 = vmatprep.subr.mxu1 %v2023_v47  ;;  %v2011_v8 = vld [vmem:[%s4720_s4 + $0x118] sm:$0xff] }
 0xac3   :  { %v1787_v0 = vmul.f32 %v4400_v2, %v4400_v2  ;;  %v1788_v33 = vmul.f32 %v4402_v57, %v4402_v57  ;;  %v1789_v31 = vmul.f32 %v4404_v24, %v4404_v24  ;;  %v1790_v38 = vmul.f32 %v4406_v58, %v4406_v58  ;;  %v2007_v11 = vld [vmem:[%s4720_s4 + $0xf8] sm:$0xff] }
 0xac5   :  { %v1791_v36 = vadd.f32 %v1788_v33, %v1787_v0  ;;  %v2006_v0 = vld [vmem:[%s4720_s4 + $0xf0] sm:$0xff]  ;;  %v2008_v33 = vld [vmem:[%s4720_s4 + $0x100] sm:$0xff] }
 0xac7   :  { %v1792_v39 = vadd.f32 %v1791_v36, %v1789_v31  ;;  %v2004_v31 = vld [vmem:[%s4720_s4 + $0xe0] sm:$0xff]  ;;  %v2003_v36 = vld [vmem:[%s4720_s4 + $0xd8] sm:$0xff] }
 0xac9   :  { %v1793_v42 = vadd.f32 %v1792_v39, %v1790_v38  ;;  %v2005_v38 = vld [vmem:[%s4720_s4 + $0xe8] sm:$0xff] }
 0xaca   :  { %v2001_v39 = vld [vmem:[%s4720_s4 + $0xc8] sm:$0xff] }
 0xacb   :  { %v1794_v43 = vrot.slane %v1793_v42, 4 }
 0xacd   :  { %v1795_v25 = vadd.f32 %v1794_v43, %v1793_v42  ;;  %v2000_v42 = vld [vmem:[%s4720_s4 + $0xc0] sm:$0xff]  ;;  %v2002_v43 = vld [vmem:[%s4720_s4 + $0xd0] sm:$0xff] }
 0xacf   :  { %v1796_v26 = vrot.slane %v1795_v25, 2 }
 0xad1   :  { %v1797_v27 = vadd.f32 %v1796_v26, %v1795_v25  ;;  %v1998_v25 = vld [vmem:[%s4720_s4 + $0xb0] sm:$0xff]  ;;  %v1997_v26 = vld [vmem:[%s4720_s4 + $0xa8] sm:$0xff] }
 0xad3   :  { %v1798_v48 = vrot.slane %v1797_v27, 1 }
 0xad5   :  { %v1799_v52 = vadd.f32 %v1798_v48, %v1797_v27  ;;  %v1999_v27 = vld [vmem:[%s4720_s4 + $0xb8] sm:$0xff] }
 0xad6   :  { %v1995_v48 = vld [vmem:[%s4720_s4 + $0x98] sm:$0xff] }
 0xad7   :  { %3175 = vmatmul.mubr.f32.vlgmr.msra.gmra.mxu1 %v1799_v52  ;;  %v1994_v52 = vld [vmem:[%s4720_s4 + $0x90] sm:$0xff] }
 0xad8   :  { %3183 = vmatpush3.msra.mxu1 %v2023_v47  ;;  %v1992_v47 = vld [vmem:[%s4720_s4 + $0x80] sm:$0xff] }
 0xad9   :  { %3184 = vmatprep.subr.mxu1 %v2020_v55 }
 0xada   :  { %3185 = vmatpush3.msra.mxu1 %v2020_v55  ;;  %v1985_v55 = vld [vmem:[%s4720_s4 + $0x48] sm:$0xff] }
 0xadb   :  { %3186 = vmatprep.subr.mxu1 %v2017_v61 }
 0xadc   :  { %3187 = vmatpush3.msra.mxu1 %v2017_v61  ;;  %v1982_v61 = vld [vmem:[%s4720_s4 + $0x30] sm:$0xff] }
 0xadd   :  { %3188 = vmatprep.subr.mxu1 %v2014_v63 }
 0xade   :  { %3189 = vmatpush3.msra.mxu1 %v2014_v63  ;;  %v1979_v63 = vld [vmem:[%s4720_s4 + $0x18] sm:$0xff] }
 0xadf   :  { %3190 = vmatprep.subr.mxu1 %v2011_v8 }
 0xae0   :  { %3191 = vmatpush3.msra.mxu1 %v2011_v8  ;;  %v1976_v8 = vld [vmem:[%s4720_s4] sm:$0xff] }
 0xae1   :  { %3192 = vmatprep.subr.mxu1 %v2008_v33 }
 0xae2   :  { %3193 = vmatpush3.msra.mxu1 %v2008_v33 }
 0xae3   :  { %3194 = vmatprep.subr.mxu1 %v2005_v38 }
 0xae4   :  { %3195 = vmatpush3.msra.mxu1 %v2005_v38 }
 0xae5   :  { %3196 = vmatprep.subr.mxu1 %v2002_v43 }
 0xae6   :  { %3197 = vmatpush3.msra.mxu1 %v2002_v43  ;;  %v2616_v43 = vld [vmem:[%s4722_s12] ss:$0 sm:$0xff] }
 0xae7   :  { %3198 = vmatprep.subr.mxu1 %v1999_v27 }
 0xae8   :  { %3199 = vmatpush3.msra.mxu1 %v1999_v27 }
 0xae9   :  { %3200 = vmatprep.subr.mxu1 %v1996_v22 }
 0xaea   :  { %3201 = vmatpush3.msra.mxu1 %v1996_v22 }
 0xb97   :  { %v1866_v40 = vpop.f32.mrf.mxu1 }
 0xb98   :  { %v1870_v37 = vmul.f32 0.001953125, %v1866_v40  ;;  %v1991_v40 = vld [vmem:[%s4720_s4 + $0x78] sm:$0xff] }
 0xb99   :  { %v3176_v28 = vpop.f32.mrf.mxu1 }
 0xb9a   :  { %3180 = vmatmul.mubr.msk.f32.vlgmr.msra.gmra.mxu0 %vm473_vm8, %v1870_v37  ;;  %v1993_v37 = vld [vmem:[%s4720_s4 + $0x88] sm:$0xff]  ;;  %v1988_v28 = vld [vmem:[%s4720_s4 + $0x60] sm:$0xff] }
 0xb9b   :  { %2025 = vmatpush1.msra.mxu0 %v2021_v41  ;;  %2088 = vmatprep.mubr.f32.mxu0 %v3327_v3  ;;  %v1989_v41 = vld [vmem:[%s4720_s4 + $0x68] sm:$0xff] }
 0xb9c   :  { %2026 = vmatprep.subr.mxu0 %v2019_v45  ;;  %3202 = vmatprep.subr.mxu1 %v1993_v37  ;;  %v1990_v45 = vld [vmem:[%s4720_s4 + $0x70] sm:$0xff] }
 0xb9d   :  { %2027 = vmatpush1.msra.mxu0 %v2018_v54  ;;  %3203 = vmatpush3.msra.mxu1 %v1993_v37  ;;  %v1986_v54 = vld [vmem:[%s4720_s4 + $0x50] sm:$0xff] }
 0xb9e   :  { %2028 = vmatprep.subr.mxu0 %v2016_v59  ;;  %v1987_v59 = vld [vmem:[%s4720_s4 + $0x58] sm:$0xff]  ;;  %3204 = vmatprep.subr.mxu1 %v1990_v45 }
 0xb9f   :  { %2029 = vmatpush1.msra.mxu0 %v2015_v60  ;;  %v1983_v60 = vld [vmem:[%s4720_s4 + $0x38] sm:$0xff]  ;;  %3205 = vmatpush3.msra.mxu1 %v1990_v45 }
 0xba0   :  { %2030 = vmatprep.subr.mxu0 %v2013_v62  ;;  %v1984_v62 = vld [vmem:[%s4720_s4 + $0x40] sm:$0xff]  ;;  %3206 = vmatprep.subr.mxu1 %v1987_v59 }
 0xba1   :  { %2031 = vmatpush1.msra.mxu0 %v2012_v23  ;;  %v1980_v23 = vld [vmem:[%s4720_s4 + $0x20] sm:$0xff]  ;;  %3207 = vmatpush3.msra.mxu1 %v1987_v59 }
 0xba2   :  { %2032 = vmatprep.subr.mxu0 %v2010_v5  ;;  %v1981_v5 = vld [vmem:[%s4720_s4 + $0x28] sm:$0xff]  ;;  %3208 = vmatprep.subr.mxu1 %v1984_v62 }
 0xba3   :  { %2033 = vmatpush1.msra.mxu0 %v2009_v7  ;;  %v1977_v7 = vld [vmem:[%s4720_s4 + $0x8] sm:$0xff]  ;;  %3209 = vmatpush3.msra.mxu1 %v1984_v62 }
 0xba4   :  { %2034 = vmatprep.subr.mxu0 %v2007_v11  ;;  %v1978_v11 = vld [vmem:[%s4720_s4 + $0x10] sm:$0xff]  ;;  %3210 = vmatprep.subr.mxu1 %v1981_v5 }
 0xba5   :  { %2035 = vmatpush1.msra.mxu0 %v2006_v0  ;;  %3211 = vmatpush3.msra.mxu1 %v1981_v5 }
 0xba6   :  { %2036 = vmatprep.subr.mxu0 %v2004_v31  ;;  %3212 = vmatprep.subr.mxu1 %v1978_v11 }
 0xba7   :  { %2037 = vmatpush1.msra.mxu0 %v2003_v36  ;;  %3213 = vmatpush3.msra.mxu1 %v1978_v11  ;;  %v1871_v36 = vld [vmem:[%s4721_s11] sm:$0x1] }
 0xba8   :  { %2038 = vmatprep.subr.mxu0 %v2001_v39  ;;  %3255 = vmatprep.subr.mxu1 %v3327_v3 }
 0xba9   :  { %2039 = vmatpush1.msra.mxu0 %v2000_v42 }
 0xbaa   :  { %2040 = vmatprep.subr.mxu0 %v1998_v25 }
 0xbab   :  { %2041 = vmatpush1.msra.mxu0 %v1997_v26 }
 0xbac   :  { %2042 = vmatprep.subr.mxu0 %v1995_v48 }
 0xbad   :  { %2043 = vmatpush1.msra.mxu0 %v1994_v52 }
 0xbae   :  { %2044 = vmatprep.subr.mxu0 %v1992_v47 }
 0xbaf   :  { %2045 = vmatpush1.msra.mxu0 %v1991_v40 }
 0xbb0   :  { %2046 = vmatprep.subr.mxu0 %v1989_v41 }
 0xbb1   :  { %2047 = vmatpush1.msra.mxu0 %v1988_v28 }
 0xbb2   :  { %2048 = vmatprep.subr.mxu0 %v1986_v54 }
 0xbb3   :  { %2049 = vmatpush1.msra.mxu0 %v1985_v55 }
 0xbb4   :  { %2050 = vmatprep.subr.mxu0 %v1983_v60 }
 0xbb5   :  { %2051 = vmatpush1.msra.mxu0 %v1982_v61 }
 0xbb6   :  { %2052 = vmatprep.subr.mxu0 %v1980_v23 }
 0xbb7   :  { %2053 = vmatpush1.msra.mxu0 %v1979_v63 }
 0xbb8   :  { %2054 = vmatprep.subr.mxu0 %v1977_v7 }
 0xbb9   :  { %2055 = vmatpush1.msra.mxu0 %v1976_v8 }
 0xbba   :  { %3220 = vmatprep.subr.mxu0 %v3327_v3 }
 0xc5a   :  { %v1941_v0 = vpop.f32.mrf.mxu0 }
 0xc5b   :  { %v1942_v33 = vadd.f32 1e-05, %v1941_v0 }
 0xc5c   :  { %v3181_v31 = vpop.f32.mrf.mxu0 }
 0xc5d   :  { %3306 = vrsqrt.f32 %v1942_v33 }
 0xc6a   :  { %v3307_v38 = vpop.eup %3306 }
 0xc6b   :  { %v1946_v39 = vmul.f32 %v3307_v38, %v1871_v36 }
 0xc6d   :  { %v1951_v42 = vrot.slane %v1946_v39, %v3724_v17 }
 0xc6f   :  { %v1953_v25 = vmul.f32 %v1951_v42, %v4400_v2  ;;  %v1954_v26 = vmul.f32 %v1951_v42, %v4402_v57  ;;  %v1955_v27 = vmul.f32 %v1951_v42, %v4404_v24  ;;  %v1956_v48 = vmul.f32 %v1951_v42, %v4406_v58 }
 0xc71   :  { %v1964_v52 = vadd.f32 %v2616_v43, %v1953_v25  ;;  %v1965_v22 = vadd.f32 %v2616_v43, %v1954_v26  ;;  %v1966_v47 = vadd.f32 %v2616_v43, %v1955_v27  ;;  %v1967_v40 = vadd.f32 %v2616_v43, %v1956_v48 }
 0xc73   :  { %v1968_v37 = vadd.f32 %v1964_v52, %v3902_v50  ;;  %v1969_v41 = vadd.f32 %v1965_v22, %v3904_v51  ;;  %v1970_v28 = vadd.f32 %v1966_v47, %v3908_v53  ;;  %v1971_v2 = vadd.f32 %v1967_v40, %v3914_v21 }
 0xc75   :  { %v1972_v45 = vmax.f32 %v1968_v37, 0.0  ;;  %v1973_v54 = vmax.f32 %v1969_v41, 0.0  ;;  %v1974_v57 = vmax.f32 %v1970_v28, 0.0  ;;  %v1975_v24 = vmax.f32 %v1971_v2, 0.0 }
 0xc77   :  { %2089 = vmatmul.mubr.f32.vlgmr.msra.gmra.mxu0 %v1972_v45  ;;  %3214 = vmatprep.mubr.f32.mxu1 %v1972_v45 }
 0xc78   :  { %3215 = vmatmul.mubr.f32.vlgmr.msra.gmra.mxu1 %v1973_v54  ;;  %2094 = vmatprep.mubr.f32.mxu0 %v3327_v3 }
 0xc79   :  { %3217 = vmatprep.mubr.f32.mxu1 %v1974_v57  ;;  %3221 = vmatpush3.msra.mxu0 %v4208_v32 }
 0xc7a   :  { %3222 = vmatprep.subr.mxu0 %v3327_v3  ;;  %3256 = vmatpush3.msra.mxu1 %v4360_v44 }
 0xc7b   :  { %2095 = vmatmul.mubr.f32.gmra.mxu0 %v1973_v54  ;;  %3260 = vmatprep.subr.mxu1 %v3327_v3 }
 0xc7c   :  { %3218 = vmatmul.mubr.f32.gmra.mxu1 %v1975_v24  ;;  %2100 = vmatprep.mubr.f32.mxu0 %v3327_v3 }
 0xc7d   :  { %3223 = vmatpush3.msra.mxu0 %v4218_v34  ;;  %3257 = vmatprep.mubr.msk.f32.mxu1 %vm3328_vm1, %v3327_v3 }
 0xc7e   :  { %3224 = vmatprep.subr.mxu0 %v3327_v3 }
 0xc7f   :  { %2101 = vmatmul.mubr.f32.gmra.mxu0 %v1974_v57 }
 0xc80   :  { %2106 = vmatprep.mubr.f32.mxu0 %v3327_v3  ;;  %3225 = vmatpush3.msra.mxu0 %v4228_v13 }
 0xc81   :  { %3226 = vmatprep.subr.mxu0 %v3327_v3 }
 0xc82   :  { %3227 = vmatpush3.msra.mxu0 %v4235_v35 }
 0xc83   :  { %2107 = vmatmul.mubr.f32.gmra.mxu0 %v1975_v24  ;;  %3228 = vmatprep.subr.mxu0 %v3327_v3 }
 0xc84   :  { %3229 = vmatpush3.msra.mxu0 %v4242_v1  ;;  %3252 = vmatprep.mubr.msk.f32.mxu0 %vm3328_vm1, %v3327_v3 }
 0xc85   :  { %3230 = vmatprep.subr.mxu0 %v3327_v3 }
 0xc86   :  { %3231 = vmatpush3.msra.mxu0 %v4251_v12 }
 0xc87   :  { %3232 = vmatprep.subr.mxu0 %v3327_v3 }
 0xc88   :  { %3233 = vmatpush3.msra.mxu0 %v4258_v4 }
 0xc89   :  { %3234 = vmatprep.subr.mxu0 %v3327_v3 }
 0xc8a   :  { %3235 = vmatpush3.msra.mxu0 %v4265_v14 }
 0xc8b   :  { %3236 = vmatprep.subr.mxu0 %v3327_v3 }
 0xc8c   :  { %3237 = vmatpush3.msra.mxu0 %v4272_v15 }
 0xc8d   :  { %3238 = vmatprep.subr.mxu0 %v3327_v3 }
 0xc8e   :  { %3239 = vmatpush3.msra.mxu0 %v4279_v18 }
 0xc8f   :  { %3240 = vmatprep.subr.mxu0 %v3327_v3 }
 0xc90   :  { %3241 = vmatpush3.msra.mxu0 %v4286_v19 }
 0xc91   :  { %3242 = vmatprep.subr.mxu0 %v3327_v3 }
 0xc92   :  { %3243 = vmatpush3.msra.mxu0 %v4293_v49 }
 0xc93   :  { %3244 = vmatprep.subr.mxu0 %v3327_v3 }
 0xc94   :  { %3245 = vmatpush3.msra.mxu0 %v4300_v9 }
 0xc95   :  { %3246 = vmatprep.subr.mxu0 %v3327_v3 }
 0xc96   :  { %3247 = vmatpush3.msra.mxu0 %v4307_v20 }
 0xc97   :  { %3248 = vmatprep.subr.mxu0 %v3327_v3 }
 0xc98   :  { %3249 = vmatpush3.msra.mxu0 %v4314_v29 }
 0xc99   :  { %3250 = vmatprep.subr.mxu0 %v3327_v3 }
 0xc9a   :  { %3251 = vmatpush3.msra.mxu0 %v4321_v30 }
 0xc9b   :  { %3295 = vmatprep.subr.mxu0 %v3327_v3 }
 0xd37   :  { %v2090_v50 = vpop.f32.mrf.mxu0 }
 0xd38   :  { %v3216_v51 = vpop.f32.mrf.mxu1  ;;  %v2198_v0 = vrot.slane %v2090_v50, 7  ;;  %v2206_v33 = vrot.slane %v2090_v50, 1 }
 0xd39   :  { %v2092_v53 = vpop.f32.mrf.mxu0  ;;  %v2215_v8 = vrot.slane %v3216_v51, 1  ;;  %v2223_v31 = vrot.slane %v3216_v51, 7 }
 0xd3a   :  { %v2179_v21 = vpop.f32.mrf.mxu1 }
 0xd3b   :  { %v2096_v58 = vpop.f32.mrf.mxu0  ;;  %v2222_v23 = vrot.slane %v2179_v21, 7  ;;  %v2214_v36 = vrot.slane %v2179_v21, 1 }
 0xd3c   :  { %v3219_v55 = vpop.f32.mrf.mxu1  ;;  %v2199_v63 = vrot.slane %v2096_v58, 7  ;;  %v2207_v5 = vrot.slane %v2096_v58, 1 }
 0xd3d   :  { %v2098_v59 = vpop.f32.mrf.mxu0  ;;  %v2228_v26 = vsel %vm288_vm2, %v2222_v23, %v2223_v31  ;;  %v2217_v48 = vrot.slane %v3219_v55, 1  ;;  %v2225_v57 = vrot.slane %v3219_v55, 7  ;;  %v2220_v21 = vsel %vm297_vm3, %v2214_v36, %v2215_v8 }
 0xd3e   :  { %v2189_v60 = vpop.f32.mrf.mxu1  ;;  %v2212_v27 = vsel %vm297_vm3, %v2206_v33, %v2207_v5  ;;  %v2204_v52 = vsel %vm288_vm2, %v2198_v0, %v2199_v63 }
 0xd3f   :  { %v2102_v61 = vpop.f32.mrf.mxu0  ;;  %v2216_v62 = vrot.slane %v2189_v60, 1  ;;  %v2224_v22 = vrot.slane %v2189_v60, 7  ;;  %v2235_v24 = vadd.f32 %v2204_v52, %v2098_v59 }
 0xd40   :  { %v2200_v11 = vrot.slane %v2102_v61, 7  ;;  %v2208_v42 = vrot.slane %v2102_v61, 1  ;;  %v2221_v61 = vsel %vm297_vm3, %v2217_v48, %v2214_v36 }
 0xd41   :  { %v2104_v7 = vpop.f32.mrf.mxu0  ;;  %v2219_v39 = vsel %vm297_vm3, %v2215_v8, %v2216_v62  ;;  %v2226_v6 = vsel %vm288_vm2, %v2224_v22, %v2225_v57  ;;  %v2218_v16 = vsel %vm297_vm3, %v2216_v62, %v2217_v48  ;;  %v2491_v48 = vld [vmem:[%s4723_s13] sm:$0x1] }
 0xd42   :  { %v2203_v47 = vsel %vm288_vm2, %v2199_v63, %v2200_v11  ;;  %v2239_v41 = vsel %vm3662_vm4, %v2228_v26, %v2219_v39 }
 0xd43   :  { %v2108_v38 = vpop.f32.mrf.mxu0  ;;  %v2243_v58 = vadd.f32 %v2239_v41, %v2235_v24 }
 0xd44   :  { %v2201_v43 = vrot.slane %v2108_v38, 7  ;;  %v2209_v25 = vrot.slane %v2108_v38, 1 }
 0xd45   :  { %v2110_v54 = vpop.f32.mrf.mxu0 }
 0xd46   :  { %v2205_v40 = vsel %vm288_vm2, %v2201_v43, %v2198_v0  ;;  %v2210_v37 = vsel %vm297_vm3, %v2208_v42, %v2209_v25  ;;  %v2202_v2 = vsel %vm288_vm2, %v2200_v11, %v2201_v43 }
 0xd47   :  { %v2230_v28 = vsel %vm3668_vm5, %v2212_v27, %v2205_v40  ;;  %v2232_v45 = vsel %vm3674_vm6, %v2210_v37, %v2203_v47  ;;  %v2237_v10 = vadd.f32 %v2202_v2, %v2110_v54  ;;  %v2619_v40 = vld [vmem:[%s4724_s14] ss:$0 sm:$0xff] }
 0xd48   :  { %v2234_v50 = vadd.f32 %v2230_v28, %v2092_v53  ;;  %v2236_v51 = vadd.f32 %v2232_v45, %v2104_v7  ;;  %v2241_v53 = vsel %vm3700_vm7, %v2226_v6, %v2221_v61 }
 0xd49   :  { %v2245_v59 = vadd.f32 %v2241_v53, %v2237_v10 }
 0xd4a   :  { %v2242_v60 = vadd.f32 %v2234_v50, %v2220_v21  ;;  %v2244_v23 = vadd.f32 %v2236_v51, %v2218_v16 }
 0xd4c   :  { %v2246_v55 = vadd.f32 %v2243_v58, %v2242_v60 }
 0xd4e   :  { %v2247_v63 = vadd.f32 %v2246_v55, %v2244_v23 }
 0xd50   :  { %v2248_v5 = vadd.f32 %v2247_v63, %v2245_v59 }
 0xd52   :  { %v2249_v7 = vrot.slane %v2248_v5, 4 }
 0xd54   :  { %v2250_v8 = vadd.f32 %v2249_v7, %v2248_v5 }
 0xd56   :  { %v2251_v11 = vrot.slane %v2250_v8, 2 }
 0xd58   :  { %v2252_v0 = vadd.f32 %v2251_v11, %v2250_v8 }
 0xd5a   :  { %v2253_v33 = vrot.slane %v2252_v0, 1 }
 0xd5c   :  { %v2254_v31 = vadd.f32 %v2253_v33, %v2252_v0 }
 0xd5e   :  { %3253 = vmatmul.mubr.f32.vlgmr.msra.gmra.mxu0 %v2254_v31 }
 0xd5f   :  { %3296 = vmatpush3.msra.mxu0 %v4360_v44  ;;  %3297 = vmatprep.mubr.msk.f32.mxu0 %vm3328_vm1, %v3327_v3 }
 0xe1e   :  { %v2321_v46 = vpop.f32.mrf.mxu0 }
 0xe1f   :  { %v2325_v62 = vmul.f32 0.001953125, %v2321_v46 }
 0xe20   :  { %v3254_v36 = vpop.f32.mrf.mxu0 }
 0xe21   :  { %3258 = vmatmul.mubr.msk.f32.vlgmr.msra.gmra.mxu1 %vm473_vm8, %v2325_v62 }
 0xe22   :  { %3261 = vmatpush3.msra.mxu1 %v4208_v32  ;;  %3292 = vmatprep.mubr.msk.f32.mxu1 %vm3328_vm1, %v3327_v3 }
 0xe23   :  { %3262 = vmatprep.subr.mxu1 %v3327_v3 }
 0xe24   :  { %3263 = vmatpush3.msra.mxu1 %v4218_v34 }
 0xe25   :  { %3264 = vmatprep.subr.mxu1 %v3327_v3 }
 0xe26   :  { %3265 = vmatpush3.msra.mxu1 %v4228_v13 }
 0xe27   :  { %3266 = vmatprep.subr.mxu1 %v3327_v3 }
 0xe28   :  { %3267 = vmatpush3.msra.mxu1 %v4235_v35 }
 0xe29   :  { %3268 = vmatprep.subr.mxu1 %v3327_v3 }
 0xe2a   :  { %3269 = vmatpush3.msra.mxu1 %v4242_v1 }
 0xe2b   :  { %3270 = vmatprep.subr.mxu1 %v3327_v3 }
 0xe2c   :  { %3271 = vmatpush3.msra.mxu1 %v4251_v12 }
 0xe2d   :  { %3272 = vmatprep.subr.mxu1 %v3327_v3 }
 0xe2e   :  { %3273 = vmatpush3.msra.mxu1 %v4258_v4 }
 0xe2f   :  { %3274 = vmatprep.subr.mxu1 %v3327_v3 }
 0xe30   :  { %3275 = vmatpush3.msra.mxu1 %v4265_v14 }
 0xe31   :  { %3276 = vmatprep.subr.mxu1 %v3327_v3 }
 0xe32   :  { %3277 = vmatpush3.msra.mxu1 %v4272_v15 }
 0xe33   :  { %3278 = vmatprep.subr.mxu1 %v3327_v3 }
 0xe34   :  { %3279 = vmatpush3.msra.mxu1 %v4279_v18 }
 0xe35   :  { %3280 = vmatprep.subr.mxu1 %v3327_v3 }
 0xe36   :  { %3281 = vmatpush3.msra.mxu1 %v4286_v19 }
 0xe37   :  { %3282 = vmatprep.subr.mxu1 %v3327_v3 }
 0xe38   :  { %3283 = vmatpush3.msra.mxu1 %v4293_v49 }
 0xe39   :  { %3284 = vmatprep.subr.mxu1 %v3327_v3 }
 0xe3a   :  { %3285 = vmatpush3.msra.mxu1 %v4300_v9 }
 0xe3b   :  { %3286 = vmatprep.subr.mxu1 %v3327_v3 }
 0xe3c   :  { %3287 = vmatpush3.msra.mxu1 %v4307_v20 }
 0xe3d   :  { %3288 = vmatprep.subr.mxu1 %v3327_v3 }
 0xe3e   :  { %3289 = vmatpush3.msra.mxu1 %v4314_v29 }
 0xe3f   :  { %3290 = vmatprep.subr.mxu1 %v3327_v3 }
 0xe40   :  { %3291 = vmatpush3.msra.mxu1 %v4321_v30 }
 0xee1   :  { %v2395_v56 = vpop.f32.mrf.mxu1 }
 0xee2   :  { %v2402_v32 = vrot.slane %v2395_v56, %v3724_v17 }
 0xee3   :  { %v3259_v34 = vpop.f32.mrf.mxu1 }
 0xee4   :  { %v2403_v13 = vsub.f32 %v2242_v60, %v2402_v32  ;;  %v2404_v35 = vsub.f32 %v2243_v58, %v2402_v32  ;;  %v2405_v1 = vsub.f32 %v2244_v23, %v2402_v32  ;;  %v2406_v12 = vsub.f32 %v2245_v59, %v2402_v32 }
 0xee6   :  { %v2407_v4 = vmul.f32 %v2403_v13, %v2403_v13  ;;  %v2408_v14 = vmul.f32 %v2404_v35, %v2404_v35  ;;  %v2409_v15 = vmul.f32 %v2405_v1, %v2405_v1  ;;  %v2410_v19 = vmul.f32 %v2406_v12, %v2406_v12 }
 0xee8   :  { %v2411_v18 = vadd.f32 %v2408_v14, %v2407_v4 }
 0xeea   :  { %v2412_v49 = vadd.f32 %v2411_v18, %v2409_v15 }
 0xeec   :  { %v2413_v9 = vadd.f32 %v2412_v49, %v2410_v19 }
 0xeee   :  { %v2414_v20 = vrot.slane %v2413_v9, 4 }
 0xef0   :  { %v2415_v29 = vadd.f32 %v2414_v20, %v2413_v9 }
 0xef2   :  { %v2416_v3 = vrot.slane %v2415_v29, 2 }
 0xef4   :  { %v2417_v44 = vadd.f32 %v2416_v3, %v2415_v29 }
 0xef6   :  { %v2418_v30 = vrot.slane %v2417_v44, 1 }
 0xef8   :  { %v2419_v38 = vadd.f32 %v2418_v30, %v2417_v44 }
 0xefa   :  { %3293 = vmatmul.mubr.f32.vlgmr.msra.gmra.mxu1 %v2419_v38 }
 0xfba   :  { %v2486_v39 = vpop.f32.mrf.mxu1 }
 0xfbb   :  { %v2490_v42 = vmul.f32 0.001953125, %v2486_v39 }
 0xfbc   :  { %v3294_v43 = vpop.f32.mrf.mxu1 }
 0xfbd   :  { %3298 = vmatmul.mubr.msk.f32.vlgmr.msra.gmra.mxu0 %vm473_vm8, %v2490_v42 }
0x107d   :  { %v2561_v25 = vpop.f32.mrf.mxu0 }
0x107e   :  { %v2562_v26 = vadd.f32 1e-05, %v2561_v25 }
0x107f   :  { %v3299_v27 = vpop.f32.mrf.mxu0 }
0x1080   :  { %3308 = vrsqrt.f32 %v2562_v26 }
0x108d   :  { %v3309_v52 = vpop.eup %3308 }
0x108e   :  { %v2566_v22 = vmul.f32 %v3309_v52, %v2491_v48 }
0x1090   :  { %v2571_v47 = vrot.slane %v2566_v22, %v3724_v17 }
0x1092   :  { %v2573_v37 = vmul.f32 %v2571_v47, %v2403_v13  ;;  %v2574_v41 = vmul.f32 %v2571_v47, %v2404_v35  ;;  %v2575_v28 = vmul.f32 %v2571_v47, %v2405_v1  ;;  %v2576_v45 = vmul.f32 %v2571_v47, %v2406_v12 }
0x1094   :  { %v2584_v54 = vadd.f32 %v2619_v40, %v2573_v37  ;;  %v2585_v2 = vadd.f32 %v2619_v40, %v2574_v41  ;;  %v2586_v57 = vadd.f32 %v2619_v40, %v2575_v28  ;;  %v2587_v24 = vadd.f32 %v2619_v40, %v2576_v45 }
0x1096   :  { %v2588_v50 = vmax.f32 %v2584_v54, 0.0  ;;  %v2589_v51 = vmax.f32 %v2585_v2, 0.0  ;;  %v2590_v21 = vmax.f32 %v2586_v57, 0.0  ;;  %v2591_v58 = vmax.f32 %v2587_v24, 0.0 }
0x1098   :  { %2592 = vst [vmem:[%s4725_s15] sm:$0xff] %v2588_v50  ;;  %2593 = vst [vmem:[%s4725_s15 + $0x8] sm:$0xff] %v2589_v51 }
0x1099   :  { %2594 = vst [vmem:[%s4725_s15 + $0x10] sm:$0xff] %v2590_v21  ;;  %2595 = vst [vmem:[%s4725_s15 + $0x18] sm:$0xff] %v2591_v58 }

</bundles_post_ra>
